<compile_context>
chip_gen: v7x
topology: tpu7x:2x2x1
jax: 0.10.0
libtpu: 0.0.40
codegen_flags: <defaults>
</compile_context>

<pallas_src>
import math

import jax
import jax.numpy as jnp
from jax.experimental import pallas as pl
from jax.experimental.pallas import tpu as pltpu

# ----------------------------- tiny BERT config ------------------------------
VOCAB      = 100
MAX_POS    = 16
TYPE_VOCAB = 2
HIDDEN     = 32
NUM_HEADS  = 2
HEAD_DIM   = HIDDEN // NUM_HEADS
FFN        = 64
NUM_LAYERS = 2
LN_EPS     = 1e-12

BATCH = 2
SEQ   = 8
ROWS  = BATCH * SEQ     # flattened [B*S, H] row count


# ------------------------------ fused Pallas kernel --------------------------
def _layernorm(x, g, b):
    mean = jnp.mean(x, axis=-1, keepdims=True)
    xc = x - mean
    var = jnp.mean(xc * xc, axis=-1, keepdims=True)
    return xc * jax.lax.rsqrt(var + LN_EPS) * g + b


def _encoder_kernel(emb_ref, mask_ref,
                    emb_ln_g_ref, emb_ln_b_ref,
                    wqkv_ref, bqkv_ref, wo_ref, bo_ref,
                    ln1_g_ref, ln1_b_ref,
                    w1_ref, b1_ref, w2_ref, b2_ref,
                    ln2_g_ref, ln2_b_ref,
                    out_ref):
    """Whole BERT encoder in one grid step.

    emb_ref : [B*S, H]    summed token+pos+type embeddings (pre-LN)
    mask_ref: [B*S, B*S]  additive mask (0 same-batch & unpadded key, -1e4 otherwise)
    weights : stacked per layer ([L, ...]); biases / LN params shaped [L, 1, N]
    out_ref : [B, H]      CLS embedding (row 0 of each sequence)
    """
    mask_add = mask_ref[...]
    h = _layernorm(emb_ref[...], emb_ln_g_ref[...], emb_ln_b_ref[...])   # [B*S, H]

    scale = 1.0 / math.sqrt(HEAD_DIM)
    qk_dims = (((1,), (1,)), ((), ()))   # q @ k^T via dim numbers (no explicit transpose)

    for l in range(NUM_LAYERS):
        # ---- fused QKV projection: one [H, 3H] matmul instead of three ----
        qkv = (jnp.dot(h, wqkv_ref[l], preferred_element_type=jnp.float32)
               + bqkv_ref[l])                                            # [B*S, 3H]

        # ---- multi-head self-attention: all batches at once, per-head lane slices ----
        head_ctx = []
        for hh in range(NUM_HEADS):
            q = qkv[:, hh * HEAD_DIM:(hh + 1) * HEAD_DIM] * scale
            k = qkv[:, HIDDEN + hh * HEAD_DIM: HIDDEN + (hh + 1) * HEAD_DIM]
            v = qkv[:, 2 * HIDDEN + hh * HEAD_DIM: 2 * HIDDEN + (hh + 1) * HEAD_DIM]
            s = jax.lax.dot_general(q, k, qk_dims,
                                    preferred_element_type=jnp.float32) + mask_add
            m = jnp.max(s, axis=-1, keepdims=True)
            e = jnp.exp(s - m)
            p = e * pl.reciprocal(jnp.sum(e, axis=-1, keepdims=True), approx=True)
            head_ctx.append(jnp.dot(p, v, preferred_element_type=jnp.float32))
        ctx = jnp.concatenate(head_ctx, axis=-1)                         # [B*S, H], in vregs

        # ---- attention output projection + residual + LN ----
        attn_out = (jnp.dot(ctx, wo_ref[l],
                            preferred_element_type=jnp.float32) + bo_ref[l])
        h = _layernorm(attn_out + h, ln1_g_ref[l], ln1_b_ref[l])

        # ---- feed-forward ----
        inter = (jnp.dot(h, w1_ref[l], preferred_element_type=jnp.float32)
                 + b1_ref[l])
        # TODO(synk): HF BERT uses exact (erf) GELU; Mosaic has no erf lowering, so the
        # tanh approximation is used here.
        inter = jax.nn.gelu(inter, approximate=True)
        ffn_out = (jnp.dot(inter, w2_ref[l], preferred_element_type=jnp.float32)
                   + b2_ref[l])
        h = _layernorm(ffn_out + h, ln2_g_ref[l], ln2_b_ref[l])

    # ---- CLS extraction: row b*SEQ of the last hidden state, single store ----
    out_ref[...] = jnp.concatenate(
        [h[b * SEQ:b * SEQ + 1, :] for b in range(BATCH)], axis=0)


# ------------------------- parameter initialization --------------------------
def init_params(key):
    def nrm(k, shape):
        return jax.random.normal(k, shape, jnp.float32) * 0.02

    keys = iter(jax.random.split(key, 3 + NUM_LAYERS * 6))
    p = {
        "word_emb": nrm(next(keys), (VOCAB, HIDDEN)),
        "pos_emb":  nrm(next(keys), (MAX_POS, HIDDEN)),
        "type_emb": nrm(next(keys), (TYPE_VOCAB, HIDDEN)),
        "emb_ln_g": jnp.ones((1, HIDDEN), jnp.float32),
        "emb_ln_b": jnp.zeros((1, HIDDEN), jnp.float32),
    }
    wqkv, wo, w1, w2 = [], [], [], []
    for _ in range(NUM_LAYERS):
        wq = nrm(next(keys), (HIDDEN, HIDDEN))
        wk = nrm(next(keys), (HIDDEN, HIDDEN))
        wv = nrm(next(keys), (HIDDEN, HIDDEN))
        wqkv.append(jnp.concatenate([wq, wk, wv], axis=1))      # [H, 3H]
        wo.append(nrm(next(keys), (HIDDEN, HIDDEN)))
        w1.append(nrm(next(keys), (HIDDEN, FFN)))
        w2.append(nrm(next(keys), (FFN, HIDDEN)))
    L = NUM_LAYERS
    p.update({
        "wqkv": jnp.stack(wqkv),                                 # [L, H, 3H]
        "bqkv": jnp.zeros((L, 1, 3 * HIDDEN), jnp.float32),
        "wo":   jnp.stack(wo),                                   # [L, H, H]
        "bo":   jnp.zeros((L, 1, HIDDEN), jnp.float32),
        "ln1_g": jnp.ones((L, 1, HIDDEN), jnp.float32),
        "ln1_b": jnp.zeros((L, 1, HIDDEN), jnp.float32),
        "w1":   jnp.stack(w1),                                   # [L, H, FFN]
        "b1":   jnp.zeros((L, 1, FFN), jnp.float32),
        "w2":   jnp.stack(w2),                                   # [L, FFN, H]
        "b2":   jnp.zeros((L, 1, HIDDEN), jnp.float32),
        "ln2_g": jnp.ones((L, 1, HIDDEN), jnp.float32),
        "ln2_b": jnp.zeros((L, 1, HIDDEN), jnp.float32),
    })
    return p


# ------------------------------- forward pass --------------------------------
def bioclinicalbert_ft_forward(params, input_ids, attention_mask):
    """Returns cls_embedding = last_hidden_state[:, 0, :]  shape [B, HIDDEN]."""
    B, S = input_ids.shape
    rows = B * S

    # ---- embeddings (gather is JAX glue; everything else is inside the kernel) ----
    tok = jnp.take(params["word_emb"], input_ids, axis=0)        # [B, S, H]
    pos = params["pos_emb"][:S][None, :, :]                      # [1, S, H]
    # token_type_ids default to all-zeros in the HF call made by the PyTorch module.
    typ = params["type_emb"][0][None, None, :]                   # [1, 1, H]
    emb = (tok + pos + typ).reshape(rows, HIDDEN).astype(jnp.float32)

    # Block-diagonal additive mask over the flattened [B*S, B*S] score matrix:
    # 0 where query & key come from the same sequence and the key is not padding,
    # -10000 otherwise (matches HF's (1 - mask) * -10000; cross-batch entries give
    # exp(-10000) == 0 in f32, i.e. exact per-batch attention).
    batch_ids = jnp.repeat(jnp.arange(B), S)                     # [B*S]
    same_batch = batch_ids[:, None] == batch_ids[None, :]
    key_valid = attention_mask.reshape(rows).astype(bool)
    mask_add = jnp.where(same_batch & key_valid[None, :],
                         0.0, -10000.0).astype(jnp.float32)

    L, H, F = NUM_LAYERS, HIDDEN, FFN
    grid_spec = pltpu.PrefetchScalarGridSpec(
        num_scalar_prefetch=0,
        grid=(1,),
        in_specs=[
            pl.BlockSpec((rows, H), lambda i: (0, 0)),           # emb
            pl.BlockSpec((rows, rows), lambda i: (0, 0)),        # mask
            pl.BlockSpec((1, H), lambda i: (0, 0)),              # emb_ln_g
            pl.BlockSpec((1, H), lambda i: (0, 0)),              # emb_ln_b
            pl.BlockSpec((L, H, 3 * H), lambda i: (0, 0, 0)),    # wqkv
            pl.BlockSpec((L, 1, 3 * H), lambda i: (0, 0, 0)),    # bqkv
            pl.BlockSpec((L, H, H), lambda i: (0, 0, 0)),        # wo
            pl.BlockSpec((L, 1, H), lambda i: (0, 0, 0)),        # bo
            pl.BlockSpec((L, 1, H), lambda i: (0, 0, 0)),        # ln1_g
            pl.BlockSpec((L, 1, H), lambda i: (0, 0, 0)),        # ln1_b
            pl.BlockSpec((L, H, F), lambda i: (0, 0, 0)),        # w1
            pl.BlockSpec((L, 1, F), lambda i: (0, 0, 0)),        # b1
            pl.BlockSpec((L, F, H), lambda i: (0, 0, 0)),        # w2
            pl.BlockSpec((L, 1, H), lambda i: (0, 0, 0)),        # b2
            pl.BlockSpec((L, 1, H), lambda i: (0, 0, 0)),        # ln2_g
            pl.BlockSpec((L, 1, H), lambda i: (0, 0, 0)),        # ln2_b
        ],
        out_specs=pl.BlockSpec((B, H), lambda i: (0, 0)),
    )
    cls_embedding = pl.pallas_call(
        _encoder_kernel,
        out_shape=jax.ShapeDtypeStruct((B, HIDDEN), jnp.float32),
        grid_spec=grid_spec,
        compiler_params=pltpu.CompilerParams(
            dimension_semantics=("arbitrary",)),
    )(emb, mask_add,
      params["emb_ln_g"], params["emb_ln_b"],
      params["wqkv"], params["bqkv"], params["wo"], params["bo"],
      params["ln1_g"], params["ln1_b"],
      params["w1"], params["b1"], params["w2"], params["b2"],
      params["ln2_g"], params["ln2_b"])
    return cls_embedding


# ----------------------------------- main -------------------------------------
if __name__ == "__main__":
    root = jax.random.PRNGKey(0)
    k_params, k_ids = jax.random.split(root)

    params = init_params(k_params)

    input_ids = jax.random.randint(k_ids, (BATCH, SEQ), 0, VOCAB, dtype=jnp.int32)
    # Deterministic padding mask: sequence 0 full length, sequence 1 padded after 5 tokens.
    lengths = jnp.array([SEQ, 5], dtype=jnp.int32)
    attention_mask = (jnp.arange(SEQ)[None, :] < lengths[:, None]).astype(jnp.int32)

    fwd = jax.jit(bioclinicalbert_ft_forward)
    cls = fwd(params, input_ids, attention_mask)
    cls = jax.block_until_ready(cls)
    assert cls.shape == (BATCH, HIDDEN) and cls.dtype == jnp.float32
    assert bool(jnp.all(jnp.isfinite(cls)))
    print("KERNEL_OK")
</pallas_src>

<mosaic_0001>
module attributes {stable_mosaic.version = 11 : i64} {
  func.func @_encoder_kernel(%arg0: i32, %arg1: memref<16x32xf32, #tpu.memory_space<vmem>>, %arg2: memref<16x16xf32, #tpu.memory_space<vmem>>, %arg3: memref<1x32xf32, #tpu.memory_space<vmem>>, %arg4: memref<1x32xf32, #tpu.memory_space<vmem>>, %arg5: memref<2x32x96xf32, #tpu.memory_space<vmem>>, %arg6: memref<2x1x96xf32, #tpu.memory_space<vmem>>, %arg7: memref<2x32x32xf32, #tpu.memory_space<vmem>>, %arg8: memref<2x1x32xf32, #tpu.memory_space<vmem>>, %arg9: memref<2x1x32xf32, #tpu.memory_space<vmem>>, %arg10: memref<2x1x32xf32, #tpu.memory_space<vmem>>, %arg11: memref<2x32x64xf32, #tpu.memory_space<vmem>>, %arg12: memref<2x1x64xf32, #tpu.memory_space<vmem>>, %arg13: memref<2x64x32xf32, #tpu.memory_space<vmem>>, %arg14: memref<2x1x32xf32, #tpu.memory_space<vmem>>, %arg15: memref<2x1x32xf32, #tpu.memory_space<vmem>>, %arg16: memref<2x1x32xf32, #tpu.memory_space<vmem>>, %arg17: memref<2x32xf32, #tpu.memory_space<vmem>>) attributes {dimension_semantics = [#tpu.dimension_semantics<arbitrary>], iteration_bounds = array<i64: 1>, scalar_prefetch = 0 : i64, scratch_operands = 0 : i64, tpu.core_type = #tpu.core_type<tc>, window_params = [{pipeline_mode = #tpu.pipeline_mode<synchronous>, transform_indices = @transform_0, window_bounds = array<i64: 16, 32>}, {pipeline_mode = #tpu.pipeline_mode<synchronous>, transform_indices = @transform_1, window_bounds = array<i64: 16, 16>}, {pipeline_mode = #tpu.pipeline_mode<synchronous>, transform_indices = @transform_2, window_bounds = array<i64: 1, 32>}, {pipeline_mode = #tpu.pipeline_mode<synchronous>, transform_indices = @transform_3, window_bounds = array<i64: 1, 32>}, {pipeline_mode = #tpu.pipeline_mode<synchronous>, transform_indices = @transform_4, window_bounds = array<i64: 2, 32, 96>}, {pipeline_mode = #tpu.pipeline_mode<synchronous>, transform_indices = @transform_5, window_bounds = array<i64: 2, 1, 96>}, {pipeline_mode = #tpu.pipeline_mode<synchronous>, transform_indices = @transform_6, window_bounds = array<i64: 2, 32, 32>}, {pipeline_mode = #tpu.pipeline_mode<synchronous>, transform_indices = @transform_7, window_bounds = array<i64: 2, 1, 32>}, {pipeline_mode = #tpu.pipeline_mode<synchronous>, transform_indices = @transform_8, window_bounds = array<i64: 2, 1, 32>}, {pipeline_mode = #tpu.pipeline_mode<synchronous>, transform_indices = @transform_9, window_bounds = array<i64: 2, 1, 32>}, {pipeline_mode = #tpu.pipeline_mode<synchronous>, transform_indices = @transform_10, window_bounds = array<i64: 2, 32, 64>}, {pipeline_mode = #tpu.pipeline_mode<synchronous>, transform_indices = @transform_11, window_bounds = array<i64: 2, 1, 64>}, {pipeline_mode = #tpu.pipeline_mode<synchronous>, transform_indices = @transform_12, window_bounds = array<i64: 2, 64, 32>}, {pipeline_mode = #tpu.pipeline_mode<synchronous>, transform_indices = @transform_13, window_bounds = array<i64: 2, 1, 32>}, {pipeline_mode = #tpu.pipeline_mode<synchronous>, transform_indices = @transform_14, window_bounds = array<i64: 2, 1, 32>}, {pipeline_mode = #tpu.pipeline_mode<synchronous>, transform_indices = @transform_15, window_bounds = array<i64: 2, 1, 32>}, {pipeline_mode = #tpu.pipeline_mode<synchronous>, transform_indices = @transform_16, window_bounds = array<i64: 2, 32>}]} {
    %c0 = arith.constant 0 : index
    %c0_0 = arith.constant 0 : index
    %0 = vector.load %arg2[%c0, %c0_0] : memref<16x16xf32, #tpu.memory_space<vmem>>, vector<16x16xf32>
    %c0_1 = arith.constant 0 : index
    %c0_2 = arith.constant 0 : index
    %1 = vector.load %arg1[%c0_1, %c0_2] : memref<16x32xf32, #tpu.memory_space<vmem>>, vector<16x32xf32>
    %c0_3 = arith.constant 0 : index
    %c0_4 = arith.constant 0 : index
    %2 = vector.load %arg3[%c0_3, %c0_4] : memref<1x32xf32, #tpu.memory_space<vmem>>, vector<1x32xf32>
    %c0_5 = arith.constant 0 : index
    %c0_6 = arith.constant 0 : index
    %3 = vector.load %arg4[%c0_5, %c0_6] : memref<1x32xf32, #tpu.memory_space<vmem>>, vector<1x32xf32>
    %cst = arith.constant dense<0.000000e+00> : vector<16xf32>
    %4 = vector.multi_reduction <add>, %1, %cst [1] : vector<16x32xf32> to vector<16xf32>
    %5 = vector.shape_cast %4 : vector<16xf32> to vector<16x1xf32>
    %cst_7 = arith.constant 3.200000e+01 : f32
    %6 = vector.broadcast %cst_7 : f32 to vector<16x1xf32>
    %7 = arith.divf %5, %6 : vector<16x1xf32>
    %8 = vector.broadcast %7 : vector<16x1xf32> to vector<16x32xf32>
    %9 = arith.subf %1, %8 : vector<16x32xf32>
    %10 = arith.mulf %9, %9 : vector<16x32xf32>
    %cst_8 = arith.constant dense<0.000000e+00> : vector<16xf32>
    %11 = vector.multi_reduction <add>, %10, %cst_8 [1] : vector<16x32xf32> to vector<16xf32>
    %12 = vector.shape_cast %11 : vector<16xf32> to vector<16x1xf32>
    %cst_9 = arith.constant 3.200000e+01 : f32
    %13 = vector.broadcast %cst_9 : f32 to vector<16x1xf32>
    %14 = arith.divf %12, %13 : vector<16x1xf32>
    %cst_10 = arith.constant 9.99999996E-13 : f32
    %15 = vector.broadcast %cst_10 : f32 to vector<16x1xf32>
    %16 = arith.addf %14, %15 : vector<16x1xf32>
    %17 = math.rsqrt %16 : vector<16x1xf32>
    %18 = vector.broadcast %17 : vector<16x1xf32> to vector<16x32xf32>
    %19 = arith.mulf %9, %18 : vector<16x32xf32>
    %20 = vector.broadcast %2 : vector<1x32xf32> to vector<16x32xf32>
    %21 = arith.mulf %19, %20 : vector<16x32xf32>
    %22 = vector.broadcast %3 : vector<1x32xf32> to vector<16x32xf32>
    %23 = arith.addf %21, %22 : vector<16x32xf32>
    %c0_11 = arith.constant 0 : index
    %c0_12 = arith.constant 0 : index
    %c0_13 = arith.constant 0 : index
    %24 = vector.load %arg5[%c0_11, %c0_12, %c0_13] : memref<2x32x96xf32, #tpu.memory_space<vmem>>, vector<1x32x96xf32>
    %25 = vector.shape_cast %24 : vector<1x32x96xf32> to vector<32x96xf32>
    %cst_14 = arith.constant dense<0.000000e+00> : vector<16x96xf32>
    %26 = tpu.matmul %23, %25, %cst_14 {dimension_numbers = #tpu.dot_dimension_numbers<[1], [0], [0], [1], [0, 0, 1, 1], [], []>} : vector<16x32xf32>, vector<32x96xf32>, vector<16x96xf32> -> vector<16x96xf32>
    %c0_15 = arith.constant 0 : index
    %c0_16 = arith.constant 0 : index
    %c0_17 = arith.constant 0 : index
    %27 = vector.load %arg6[%c0_15, %c0_16, %c0_17] : memref<2x1x96xf32, #tpu.memory_space<vmem>>, vector<1x1x96xf32>
    %28 = vector.shape_cast %27 : vector<1x1x96xf32> to vector<1x96xf32>
    %29 = vector.broadcast %28 : vector<1x96xf32> to vector<16x96xf32>
    %30 = arith.addf %26, %29 : vector<16x96xf32>
    %31 = vector.extract_strided_slice %30 {offsets = [0, 0], sizes = [16, 16], strides = [1, 1]} : vector<16x96xf32> to vector<16x16xf32>
    %cst_18 = arith.constant 2.500000e-01 : f32
    %32 = vector.broadcast %cst_18 : f32 to vector<16x16xf32>
    %33 = arith.mulf %31, %32 : vector<16x16xf32>
    %34 = vector.extract_strided_slice %30 {offsets = [0, 32], sizes = [16, 16], strides = [1, 1]} : vector<16x96xf32> to vector<16x16xf32>
    %35 = vector.extract_strided_slice %30 {offsets = [0, 64], sizes = [16, 16], strides = [1, 1]} : vector<16x96xf32> to vector<16x16xf32>
    %cst_19 = arith.constant dense<0.000000e+00> : vector<16x16xf32>
    %36 = tpu.matmul %33, %34, %cst_19 {dimension_numbers = #tpu.dot_dimension_numbers<[1], [1], [0], [0], [0, 0, 1, 0], [], []>} : vector<16x16xf32>, vector<16x16xf32>, vector<16x16xf32> -> vector<16x16xf32>
    %37 = arith.addf %36, %0 : vector<16x16xf32>
    %cst_20 = arith.constant dense<0xFF800000> : vector<16xf32>
    %38 = vector.multi_reduction <maximumf>, %37, %cst_20 [1] : vector<16x16xf32> to vector<16xf32>
    %39 = vector.shape_cast %38 : vector<16xf32> to vector<16x1xf32>
    %40 = vector.broadcast %39 : vector<16x1xf32> to vector<16x16xf32>
    %41 = arith.subf %37, %40 : vector<16x16xf32>
    %42 = math.exp %41 : vector<16x16xf32>
    %cst_21 = arith.constant dense<0.000000e+00> : vector<16xf32>
    %43 = vector.multi_reduction <add>, %42, %cst_21 [1] : vector<16x16xf32> to vector<16xf32>
    %44 = vector.shape_cast %43 : vector<16xf32> to vector<16x1xf32>
    %45 = tpu.reciprocal %44 {approx = true} : vector<16x1xf32> -> vector<16x1xf32>
    %46 = vector.broadcast %45 : vector<16x1xf32> to vector<16x16xf32>
    %47 = arith.mulf %42, %46 : vector<16x16xf32>
    %cst_22 = arith.constant dense<0.000000e+00> : vector<16x16xf32>
    %48 = tpu.matmul %47, %35, %cst_22 {dimension_numbers = #tpu.dot_dimension_numbers<[1], [0], [0], [1], [0, 0, 1, 1], [], []>} : vector<16x16xf32>, vector<16x16xf32>, vector<16x16xf32> -> vector<16x16xf32>
    %49 = vector.extract_strided_slice %30 {offsets = [0, 16], sizes = [16, 16], strides = [1, 1]} : vector<16x96xf32> to vector<16x16xf32>
    %cst_23 = arith.constant 2.500000e-01 : f32
    %50 = vector.broadcast %cst_23 : f32 to vector<16x16xf32>
    %51 = arith.mulf %49, %50 : vector<16x16xf32>
    %52 = vector.extract_strided_slice %30 {offsets = [0, 48], sizes = [16, 16], strides = [1, 1]} : vector<16x96xf32> to vector<16x16xf32>
    %53 = vector.extract_strided_slice %30 {offsets = [0, 80], sizes = [16, 16], strides = [1, 1]} : vector<16x96xf32> to vector<16x16xf32>
    %cst_24 = arith.constant dense<0.000000e+00> : vector<16x16xf32>
    %54 = tpu.matmul %51, %52, %cst_24 {dimension_numbers = #tpu.dot_dimension_numbers<[1], [1], [0], [0], [0, 0, 1, 0], [], []>} : vector<16x16xf32>, vector<16x16xf32>, vector<16x16xf32> -> vector<16x16xf32>
    %55 = arith.addf %54, %0 : vector<16x16xf32>
    %cst_25 = arith.constant dense<0xFF800000> : vector<16xf32>
    %56 = vector.multi_reduction <maximumf>, %55, %cst_25 [1] : vector<16x16xf32> to vector<16xf32>
    %57 = vector.shape_cast %56 : vector<16xf32> to vector<16x1xf32>
    %58 = vector.broadcast %57 : vector<16x1xf32> to vector<16x16xf32>
    %59 = arith.subf %55, %58 : vector<16x16xf32>
    %60 = math.exp %59 : vector<16x16xf32>
    %cst_26 = arith.constant dense<0.000000e+00> : vector<16xf32>
    %61 = vector.multi_reduction <add>, %60, %cst_26 [1] : vector<16x16xf32> to vector<16xf32>
    %62 = vector.shape_cast %61 : vector<16xf32> to vector<16x1xf32>
    %63 = tpu.reciprocal %62 {approx = true} : vector<16x1xf32> -> vector<16x1xf32>
    %64 = vector.broadcast %63 : vector<16x1xf32> to vector<16x16xf32>
    %65 = arith.mulf %60, %64 : vector<16x16xf32>
    %cst_27 = arith.constant dense<0.000000e+00> : vector<16x16xf32>
    %66 = tpu.matmul %65, %53, %cst_27 {dimension_numbers = #tpu.dot_dimension_numbers<[1], [0], [0], [1], [0, 0, 1, 1], [], []>} : vector<16x16xf32>, vector<16x16xf32>, vector<16x16xf32> -> vector<16x16xf32>
    %67 = tpu.concatenate %48, %66 in 1 : vector<16x16xf32>, vector<16x16xf32> -> vector<16x32xf32>
    %c0_28 = arith.constant 0 : index
    %c0_29 = arith.constant 0 : index
    %c0_30 = arith.constant 0 : index
    %68 = vector.load %arg7[%c0_28, %c0_29, %c0_30] : memref<2x32x32xf32, #tpu.memory_space<vmem>>, vector<1x32x32xf32>
    %69 = vector.shape_cast %68 : vector<1x32x32xf32> to vector<32x32xf32>
    %cst_31 = arith.constant dense<0.000000e+00> : vector<16x32xf32>
    %70 = tpu.matmul %67, %69, %cst_31 {dimension_numbers = #tpu.dot_dimension_numbers<[1], [0], [0], [1], [0, 0, 1, 1], [], []>} : vector<16x32xf32>, vector<32x32xf32>, vector<16x32xf32> -> vector<16x32xf32>
    %c0_32 = arith.constant 0 : index
    %c0_33 = arith.constant 0 : index
    %c0_34 = arith.constant 0 : index
    %71 = vector.load %arg8[%c0_32, %c0_33, %c0_34] : memref<2x1x32xf32, #tpu.memory_space<vmem>>, vector<1x1x32xf32>
    %72 = vector.shape_cast %71 : vector<1x1x32xf32> to vector<1x32xf32>
    %73 = vector.broadcast %72 : vector<1x32xf32> to vector<16x32xf32>
    %74 = arith.addf %70, %73 : vector<16x32xf32>
    %75 = arith.addf %74, %23 : vector<16x32xf32>
    %c0_35 = arith.constant 0 : index
    %c0_36 = arith.constant 0 : index
    %c0_37 = arith.constant 0 : index
    %76 = vector.load %arg9[%c0_35, %c0_36, %c0_37] : memref<2x1x32xf32, #tpu.memory_space<vmem>>, vector<1x1x32xf32>
    %77 = vector.shape_cast %76 : vector<1x1x32xf32> to vector<1x32xf32>
    %c0_38 = arith.constant 0 : index
    %c0_39 = arith.constant 0 : index
    %c0_40 = arith.constant 0 : index
    %78 = vector.load %arg10[%c0_38, %c0_39, %c0_40] : memref<2x1x32xf32, #tpu.memory_space<vmem>>, vector<1x1x32xf32>
    %79 = vector.shape_cast %78 : vector<1x1x32xf32> to vector<1x32xf32>
    %cst_41 = arith.constant dense<0.000000e+00> : vector<16xf32>
    %80 = vector.multi_reduction <add>, %75, %cst_41 [1] : vector<16x32xf32> to vector<16xf32>
    %81 = vector.shape_cast %80 : vector<16xf32> to vector<16x1xf32>
    %cst_42 = arith.constant 3.200000e+01 : f32
    %82 = vector.broadcast %cst_42 : f32 to vector<16x1xf32>
    %83 = arith.divf %81, %82 : vector<16x1xf32>
    %84 = vector.broadcast %83 : vector<16x1xf32> to vector<16x32xf32>
    %85 = arith.subf %75, %84 : vector<16x32xf32>
    %86 = arith.mulf %85, %85 : vector<16x32xf32>
    %cst_43 = arith.constant dense<0.000000e+00> : vector<16xf32>
    %87 = vector.multi_reduction <add>, %86, %cst_43 [1] : vector<16x32xf32> to vector<16xf32>
    %88 = vector.shape_cast %87 : vector<16xf32> to vector<16x1xf32>
    %cst_44 = arith.constant 3.200000e+01 : f32
    %89 = vector.broadcast %cst_44 : f32 to vector<16x1xf32>
    %90 = arith.divf %88, %89 : vector<16x1xf32>
    %cst_45 = arith.constant 9.99999996E-13 : f32
    %91 = vector.broadcast %cst_45 : f32 to vector<16x1xf32>
    %92 = arith.addf %90, %91 : vector<16x1xf32>
    %93 = math.rsqrt %92 : vector<16x1xf32>
    %94 = vector.broadcast %93 : vector<16x1xf32> to vector<16x32xf32>
    %95 = arith.mulf %85, %94 : vector<16x32xf32>
    %96 = vector.broadcast %77 : vector<1x32xf32> to vector<16x32xf32>
    %97 = arith.mulf %95, %96 : vector<16x32xf32>
    %98 = vector.broadcast %79 : vector<1x32xf32> to vector<16x32xf32>
    %99 = arith.addf %97, %98 : vector<16x32xf32>
    %c0_46 = arith.constant 0 : index
    %c0_47 = arith.constant 0 : index
    %c0_48 = arith.constant 0 : index
    %100 = vector.load %arg11[%c0_46, %c0_47, %c0_48] : memref<2x32x64xf32, #tpu.memory_space<vmem>>, vector<1x32x64xf32>
    %101 = vector.shape_cast %100 : vector<1x32x64xf32> to vector<32x64xf32>
    %cst_49 = arith.constant dense<0.000000e+00> : vector<16x64xf32>
    %102 = tpu.matmul %99, %101, %cst_49 {dimension_numbers = #tpu.dot_dimension_numbers<[1], [0], [0], [1], [0, 0, 1, 1], [], []>} : vector<16x32xf32>, vector<32x64xf32>, vector<16x64xf32> -> vector<16x64xf32>
    %c0_50 = arith.constant 0 : index
    %c0_51 = arith.constant 0 : index
    %c0_52 = arith.constant 0 : index
    %103 = vector.load %arg12[%c0_50, %c0_51, %c0_52] : memref<2x1x64xf32, #tpu.memory_space<vmem>>, vector<1x1x64xf32>
    %104 = vector.shape_cast %103 : vector<1x1x64xf32> to vector<1x64xf32>
    %105 = vector.broadcast %104 : vector<1x64xf32> to vector<16x64xf32>
    %106 = arith.addf %102, %105 : vector<16x64xf32>
    %107 = arith.mulf %106, %106 : vector<16x64xf32>
    %108 = arith.mulf %106, %107 : vector<16x64xf32>
    %cst_53 = arith.constant 4.471500e-02 : f32
    %109 = vector.broadcast %cst_53 : f32 to vector<16x64xf32>
    %110 = arith.mulf %109, %108 : vector<16x64xf32>
    %111 = arith.addf %106, %110 : vector<16x64xf32>
    %cst_54 = arith.constant 0.797884583 : f32
    %112 = vector.broadcast %cst_54 : f32 to vector<16x64xf32>
    %113 = arith.mulf %112, %111 : vector<16x64xf32>
    %114 = math.tanh %113 : vector<16x64xf32>
    %cst_55 = arith.constant 1.000000e+00 : f32
    %115 = vector.broadcast %cst_55 : f32 to vector<16x64xf32>
    %116 = arith.addf %115, %114 : vector<16x64xf32>
    %cst_56 = arith.constant 5.000000e-01 : f32
    %117 = vector.broadcast %cst_56 : f32 to vector<16x64xf32>
    %118 = arith.mulf %117, %116 : vector<16x64xf32>
    %119 = arith.mulf %106, %118 : vector<16x64xf32>
    %c0_57 = arith.constant 0 : index
    %c0_58 = arith.constant 0 : index
    %c0_59 = arith.constant 0 : index
    %120 = vector.load %arg13[%c0_57, %c0_58, %c0_59] : memref<2x64x32xf32, #tpu.memory_space<vmem>>, vector<1x64x32xf32>
    %121 = vector.shape_cast %120 : vector<1x64x32xf32> to vector<64x32xf32>
    %cst_60 = arith.constant dense<0.000000e+00> : vector<16x32xf32>
    %122 = tpu.matmul %119, %121, %cst_60 {dimension_numbers = #tpu.dot_dimension_numbers<[1], [0], [0], [1], [0, 0, 1, 1], [], []>} : vector<16x64xf32>, vector<64x32xf32>, vector<16x32xf32> -> vector<16x32xf32>
    %c0_61 = arith.constant 0 : index
    %c0_62 = arith.constant 0 : index
    %c0_63 = arith.constant 0 : index
    %123 = vector.load %arg14[%c0_61, %c0_62, %c0_63] : memref<2x1x32xf32, #tpu.memory_space<vmem>>, vector<1x1x32xf32>
    %124 = vector.shape_cast %123 : vector<1x1x32xf32> to vector<1x32xf32>
    %125 = vector.broadcast %124 : vector<1x32xf32> to vector<16x32xf32>
    %126 = arith.addf %122, %125 : vector<16x32xf32>
    %127 = arith.addf %126, %99 : vector<16x32xf32>
    %c0_64 = arith.constant 0 : index
    %c0_65 = arith.constant 0 : index
    %c0_66 = arith.constant 0 : index
    %128 = vector.load %arg15[%c0_64, %c0_65, %c0_66] : memref<2x1x32xf32, #tpu.memory_space<vmem>>, vector<1x1x32xf32>
    %129 = vector.shape_cast %128 : vector<1x1x32xf32> to vector<1x32xf32>
    %c0_67 = arith.constant 0 : index
    %c0_68 = arith.constant 0 : index
    %c0_69 = arith.constant 0 : index
    %130 = vector.load %arg16[%c0_67, %c0_68, %c0_69] : memref<2x1x32xf32, #tpu.memory_space<vmem>>, vector<1x1x32xf32>
    %131 = vector.shape_cast %130 : vector<1x1x32xf32> to vector<1x32xf32>
    %cst_70 = arith.constant dense<0.000000e+00> : vector<16xf32>
    %132 = vector.multi_reduction <add>, %127, %cst_70 [1] : vector<16x32xf32> to vector<16xf32>
    %133 = vector.shape_cast %132 : vector<16xf32> to vector<16x1xf32>
    %cst_71 = arith.constant 3.200000e+01 : f32
    %134 = vector.broadcast %cst_71 : f32 to vector<16x1xf32>
    %135 = arith.divf %133, %134 : vector<16x1xf32>
    %136 = vector.broadcast %135 : vector<16x1xf32> to vector<16x32xf32>
    %137 = arith.subf %127, %136 : vector<16x32xf32>
    %138 = arith.mulf %137, %137 : vector<16x32xf32>
    %cst_72 = arith.constant dense<0.000000e+00> : vector<16xf32>
    %139 = vector.multi_reduction <add>, %138, %cst_72 [1] : vector<16x32xf32> to vector<16xf32>
    %140 = vector.shape_cast %139 : vector<16xf32> to vector<16x1xf32>
    %cst_73 = arith.constant 3.200000e+01 : f32
    %141 = vector.broadcast %cst_73 : f32 to vector<16x1xf32>
    %142 = arith.divf %140, %141 : vector<16x1xf32>
    %cst_74 = arith.constant 9.99999996E-13 : f32
    %143 = vector.broadcast %cst_74 : f32 to vector<16x1xf32>
    %144 = arith.addf %142, %143 : vector<16x1xf32>
    %145 = math.rsqrt %144 : vector<16x1xf32>
    %146 = vector.broadcast %145 : vector<16x1xf32> to vector<16x32xf32>
    %147 = arith.mulf %137, %146 : vector<16x32xf32>
    %148 = vector.broadcast %129 : vector<1x32xf32> to vector<16x32xf32>
    %149 = arith.mulf %147, %148 : vector<16x32xf32>
    %150 = vector.broadcast %131 : vector<1x32xf32> to vector<16x32xf32>
    %151 = arith.addf %149, %150 : vector<16x32xf32>
    %c1 = arith.constant 1 : index
    %c0_75 = arith.constant 0 : index
    %c0_76 = arith.constant 0 : index
    %152 = vector.load %arg5[%c1, %c0_75, %c0_76] : memref<2x32x96xf32, #tpu.memory_space<vmem>>, vector<1x32x96xf32>
    %153 = vector.shape_cast %152 : vector<1x32x96xf32> to vector<32x96xf32>
    %cst_77 = arith.constant dense<0.000000e+00> : vector<16x96xf32>
    %154 = tpu.matmul %151, %153, %cst_77 {dimension_numbers = #tpu.dot_dimension_numbers<[1], [0], [0], [1], [0, 0, 1, 1], [], []>} : vector<16x32xf32>, vector<32x96xf32>, vector<16x96xf32> -> vector<16x96xf32>
    %c1_78 = arith.constant 1 : index
    %c0_79 = arith.constant 0 : index
    %c0_80 = arith.constant 0 : index
    %155 = vector.load %arg6[%c1_78, %c0_79, %c0_80] : memref<2x1x96xf32, #tpu.memory_space<vmem>>, vector<1x1x96xf32>
    %156 = vector.shape_cast %155 : vector<1x1x96xf32> to vector<1x96xf32>
    %157 = vector.broadcast %156 : vector<1x96xf32> to vector<16x96xf32>
    %158 = arith.addf %154, %157 : vector<16x96xf32>
    %159 = vector.extract_strided_slice %158 {offsets = [0, 0], sizes = [16, 16], strides = [1, 1]} : vector<16x96xf32> to vector<16x16xf32>
    %cst_81 = arith.constant 2.500000e-01 : f32
    %160 = vector.broadcast %cst_81 : f32 to vector<16x16xf32>
    %161 = arith.mulf %159, %160 : vector<16x16xf32>
    %162 = vector.extract_strided_slice %158 {offsets = [0, 32], sizes = [16, 16], strides = [1, 1]} : vector<16x96xf32> to vector<16x16xf32>
    %163 = vector.extract_strided_slice %158 {offsets = [0, 64], sizes = [16, 16], strides = [1, 1]} : vector<16x96xf32> to vector<16x16xf32>
    %cst_82 = arith.constant dense<0.000000e+00> : vector<16x16xf32>
    %164 = tpu.matmul %161, %162, %cst_82 {dimension_numbers = #tpu.dot_dimension_numbers<[1], [1], [0], [0], [0, 0, 1, 0], [], []>} : vector<16x16xf32>, vector<16x16xf32>, vector<16x16xf32> -> vector<16x16xf32>
    %165 = arith.addf %164, %0 : vector<16x16xf32>
    %cst_83 = arith.constant dense<0xFF800000> : vector<16xf32>
    %166 = vector.multi_reduction <maximumf>, %165, %cst_83 [1] : vector<16x16xf32> to vector<16xf32>
    %167 = vector.shape_cast %166 : vector<16xf32> to vector<16x1xf32>
    %168 = vector.broadcast %167 : vector<16x1xf32> to vector<16x16xf32>
    %169 = arith.subf %165, %168 : vector<16x16xf32>
    %170 = math.exp %169 : vector<16x16xf32>
    %cst_84 = arith.constant dense<0.000000e+00> : vector<16xf32>
    %171 = vector.multi_reduction <add>, %170, %cst_84 [1] : vector<16x16xf32> to vector<16xf32>
    %172 = vector.shape_cast %171 : vector<16xf32> to vector<16x1xf32>
    %173 = tpu.reciprocal %172 {approx = true} : vector<16x1xf32> -> vector<16x1xf32>
    %174 = vector.broadcast %173 : vector<16x1xf32> to vector<16x16xf32>
    %175 = arith.mulf %170, %174 : vector<16x16xf32>
    %cst_85 = arith.constant dense<0.000000e+00> : vector<16x16xf32>
    %176 = tpu.matmul %175, %163, %cst_85 {dimension_numbers = #tpu.dot_dimension_numbers<[1], [0], [0], [1], [0, 0, 1, 1], [], []>} : vector<16x16xf32>, vector<16x16xf32>, vector<16x16xf32> -> vector<16x16xf32>
    %177 = vector.extract_strided_slice %158 {offsets = [0, 16], sizes = [16, 16], strides = [1, 1]} : vector<16x96xf32> to vector<16x16xf32>
    %cst_86 = arith.constant 2.500000e-01 : f32
    %178 = vector.broadcast %cst_86 : f32 to vector<16x16xf32>
    %179 = arith.mulf %177, %178 : vector<16x16xf32>
    %180 = vector.extract_strided_slice %158 {offsets = [0, 48], sizes = [16, 16], strides = [1, 1]} : vector<16x96xf32> to vector<16x16xf32>
    %181 = vector.extract_strided_slice %158 {offsets = [0, 80], sizes = [16, 16], strides = [1, 1]} : vector<16x96xf32> to vector<16x16xf32>
    %cst_87 = arith.constant dense<0.000000e+00> : vector<16x16xf32>
    %182 = tpu.matmul %179, %180, %cst_87 {dimension_numbers = #tpu.dot_dimension_numbers<[1], [1], [0], [0], [0, 0, 1, 0], [], []>} : vector<16x16xf32>, vector<16x16xf32>, vector<16x16xf32> -> vector<16x16xf32>
    %183 = arith.addf %182, %0 : vector<16x16xf32>
    %cst_88 = arith.constant dense<0xFF800000> : vector<16xf32>
    %184 = vector.multi_reduction <maximumf>, %183, %cst_88 [1] : vector<16x16xf32> to vector<16xf32>
    %185 = vector.shape_cast %184 : vector<16xf32> to vector<16x1xf32>
    %186 = vector.broadcast %185 : vector<16x1xf32> to vector<16x16xf32>
    %187 = arith.subf %183, %186 : vector<16x16xf32>
    %188 = math.exp %187 : vector<16x16xf32>
    %cst_89 = arith.constant dense<0.000000e+00> : vector<16xf32>
    %189 = vector.multi_reduction <add>, %188, %cst_89 [1] : vector<16x16xf32> to vector<16xf32>
    %190 = vector.shape_cast %189 : vector<16xf32> to vector<16x1xf32>
    %191 = tpu.reciprocal %190 {approx = true} : vector<16x1xf32> -> vector<16x1xf32>
    %192 = vector.broadcast %191 : vector<16x1xf32> to vector<16x16xf32>
    %193 = arith.mulf %188, %192 : vector<16x16xf32>
    %cst_90 = arith.constant dense<0.000000e+00> : vector<16x16xf32>
    %194 = tpu.matmul %193, %181, %cst_90 {dimension_numbers = #tpu.dot_dimension_numbers<[1], [0], [0], [1], [0, 0, 1, 1], [], []>} : vector<16x16xf32>, vector<16x16xf32>, vector<16x16xf32> -> vector<16x16xf32>
    %195 = tpu.concatenate %176, %194 in 1 : vector<16x16xf32>, vector<16x16xf32> -> vector<16x32xf32>
    %c1_91 = arith.constant 1 : index
    %c0_92 = arith.constant 0 : index
    %c0_93 = arith.constant 0 : index
    %196 = vector.load %arg7[%c1_91, %c0_92, %c0_93] : memref<2x32x32xf32, #tpu.memory_space<vmem>>, vector<1x32x32xf32>
    %197 = vector.shape_cast %196 : vector<1x32x32xf32> to vector<32x32xf32>
    %cst_94 = arith.constant dense<0.000000e+00> : vector<16x32xf32>
    %198 = tpu.matmul %195, %197, %cst_94 {dimension_numbers = #tpu.dot_dimension_numbers<[1], [0], [0], [1], [0, 0, 1, 1], [], []>} : vector<16x32xf32>, vector<32x32xf32>, vector<16x32xf32> -> vector<16x32xf32>
    %c1_95 = arith.constant 1 : index
    %c0_96 = arith.constant 0 : index
    %c0_97 = arith.constant 0 : index
    %199 = vector.load %arg8[%c1_95, %c0_96, %c0_97] : memref<2x1x32xf32, #tpu.memory_space<vmem>>, vector<1x1x32xf32>
    %200 = vector.shape_cast %199 : vector<1x1x32xf32> to vector<1x32xf32>
    %201 = vector.broadcast %200 : vector<1x32xf32> to vector<16x32xf32>
    %202 = arith.addf %198, %201 : vector<16x32xf32>
    %203 = arith.addf %202, %151 : vector<16x32xf32>
    %c1_98 = arith.constant 1 : index
    %c0_99 = arith.constant 0 : index
    %c0_100 = arith.constant 0 : index
    %204 = vector.load %arg9[%c1_98, %c0_99, %c0_100] : memref<2x1x32xf32, #tpu.memory_space<vmem>>, vector<1x1x32xf32>
    %205 = vector.shape_cast %204 : vector<1x1x32xf32> to vector<1x32xf32>
    %c1_101 = arith.constant 1 : index
    %c0_102 = arith.constant 0 : index
    %c0_103 = arith.constant 0 : index
    %206 = vector.load %arg10[%c1_101, %c0_102, %c0_103] : memref<2x1x32xf32, #tpu.memory_space<vmem>>, vector<1x1x32xf32>
    %207 = vector.shape_cast %206 : vector<1x1x32xf32> to vector<1x32xf32>
    %cst_104 = arith.constant dense<0.000000e+00> : vector<16xf32>
    %208 = vector.multi_reduction <add>, %203, %cst_104 [1] : vector<16x32xf32> to vector<16xf32>
    %209 = vector.shape_cast %208 : vector<16xf32> to vector<16x1xf32>
    %cst_105 = arith.constant 3.200000e+01 : f32
    %210 = vector.broadcast %cst_105 : f32 to vector<16x1xf32>
    %211 = arith.divf %209, %210 : vector<16x1xf32>
    %212 = vector.broadcast %211 : vector<16x1xf32> to vector<16x32xf32>
    %213 = arith.subf %203, %212 : vector<16x32xf32>
    %214 = arith.mulf %213, %213 : vector<16x32xf32>
    %cst_106 = arith.constant dense<0.000000e+00> : vector<16xf32>
    %215 = vector.multi_reduction <add>, %214, %cst_106 [1] : vector<16x32xf32> to vector<16xf32>
    %216 = vector.shape_cast %215 : vector<16xf32> to vector<16x1xf32>
    %cst_107 = arith.constant 3.200000e+01 : f32
    %217 = vector.broadcast %cst_107 : f32 to vector<16x1xf32>
    %218 = arith.divf %216, %217 : vector<16x1xf32>
    %cst_108 = arith.constant 9.99999996E-13 : f32
    %219 = vector.broadcast %cst_108 : f32 to vector<16x1xf32>
    %220 = arith.addf %218, %219 : vector<16x1xf32>
    %221 = math.rsqrt %220 : vector<16x1xf32>
    %222 = vector.broadcast %221 : vector<16x1xf32> to vector<16x32xf32>
    %223 = arith.mulf %213, %222 : vector<16x32xf32>
    %224 = vector.broadcast %205 : vector<1x32xf32> to vector<16x32xf32>
    %225 = arith.mulf %223, %224 : vector<16x32xf32>
    %226 = vector.broadcast %207 : vector<1x32xf32> to vector<16x32xf32>
    %227 = arith.addf %225, %226 : vector<16x32xf32>
    %c1_109 = arith.constant 1 : index
    %c0_110 = arith.constant 0 : index
    %c0_111 = arith.constant 0 : index
    %228 = vector.load %arg11[%c1_109, %c0_110, %c0_111] : memref<2x32x64xf32, #tpu.memory_space<vmem>>, vector<1x32x64xf32>
    %229 = vector.shape_cast %228 : vector<1x32x64xf32> to vector<32x64xf32>
    %cst_112 = arith.constant dense<0.000000e+00> : vector<16x64xf32>
    %230 = tpu.matmul %227, %229, %cst_112 {dimension_numbers = #tpu.dot_dimension_numbers<[1], [0], [0], [1], [0, 0, 1, 1], [], []>} : vector<16x32xf32>, vector<32x64xf32>, vector<16x64xf32> -> vector<16x64xf32>
    %c1_113 = arith.constant 1 : index
    %c0_114 = arith.constant 0 : index
    %c0_115 = arith.constant 0 : index
    %231 = vector.load %arg12[%c1_113, %c0_114, %c0_115] : memref<2x1x64xf32, #tpu.memory_space<vmem>>, vector<1x1x64xf32>
    %232 = vector.shape_cast %231 : vector<1x1x64xf32> to vector<1x64xf32>
    %233 = vector.broadcast %232 : vector<1x64xf32> to vector<16x64xf32>
    %234 = arith.addf %230, %233 : vector<16x64xf32>
    %235 = arith.mulf %234, %234 : vector<16x64xf32>
    %236 = arith.mulf %234, %235 : vector<16x64xf32>
    %cst_116 = arith.constant 4.471500e-02 : f32
    %237 = vector.broadcast %cst_116 : f32 to vector<16x64xf32>
    %238 = arith.mulf %237, %236 : vector<16x64xf32>
    %239 = arith.addf %234, %238 : vector<16x64xf32>
    %cst_117 = arith.constant 0.797884583 : f32
    %240 = vector.broadcast %cst_117 : f32 to vector<16x64xf32>
    %241 = arith.mulf %240, %239 : vector<16x64xf32>
    %242 = math.tanh %241 : vector<16x64xf32>
    %cst_118 = arith.constant 1.000000e+00 : f32
    %243 = vector.broadcast %cst_118 : f32 to vector<16x64xf32>
    %244 = arith.addf %243, %242 : vector<16x64xf32>
    %cst_119 = arith.constant 5.000000e-01 : f32
    %245 = vector.broadcast %cst_119 : f32 to vector<16x64xf32>
    %246 = arith.mulf %245, %244 : vector<16x64xf32>
    %247 = arith.mulf %234, %246 : vector<16x64xf32>
    %c1_120 = arith.constant 1 : index
    %c0_121 = arith.constant 0 : index
    %c0_122 = arith.constant 0 : index
    %248 = vector.load %arg13[%c1_120, %c0_121, %c0_122] : memref<2x64x32xf32, #tpu.memory_space<vmem>>, vector<1x64x32xf32>
    %249 = vector.shape_cast %248 : vector<1x64x32xf32> to vector<64x32xf32>
    %cst_123 = arith.constant dense<0.000000e+00> : vector<16x32xf32>
    %250 = tpu.matmul %247, %249, %cst_123 {dimension_numbers = #tpu.dot_dimension_numbers<[1], [0], [0], [1], [0, 0, 1, 1], [], []>} : vector<16x64xf32>, vector<64x32xf32>, vector<16x32xf32> -> vector<16x32xf32>
    %c1_124 = arith.constant 1 : index
    %c0_125 = arith.constant 0 : index
    %c0_126 = arith.constant 0 : index
    %251 = vector.load %arg14[%c1_124, %c0_125, %c0_126] : memref<2x1x32xf32, #tpu.memory_space<vmem>>, vector<1x1x32xf32>
    %252 = vector.shape_cast %251 : vector<1x1x32xf32> to vector<1x32xf32>
    %253 = vector.broadcast %252 : vector<1x32xf32> to vector<16x32xf32>
    %254 = arith.addf %250, %253 : vector<16x32xf32>
    %255 = arith.addf %254, %227 : vector<16x32xf32>
    %c1_127 = arith.constant 1 : index
    %c0_128 = arith.constant 0 : index
    %c0_129 = arith.constant 0 : index
    %256 = vector.load %arg15[%c1_127, %c0_128, %c0_129] : memref<2x1x32xf32, #tpu.memory_space<vmem>>, vector<1x1x32xf32>
    %257 = vector.shape_cast %256 : vector<1x1x32xf32> to vector<1x32xf32>
    %c1_130 = arith.constant 1 : index
    %c0_131 = arith.constant 0 : index
    %c0_132 = arith.constant 0 : index
    %258 = vector.load %arg16[%c1_130, %c0_131, %c0_132] : memref<2x1x32xf32, #tpu.memory_space<vmem>>, vector<1x1x32xf32>
    %259 = vector.shape_cast %258 : vector<1x1x32xf32> to vector<1x32xf32>
    %cst_133 = arith.constant dense<0.000000e+00> : vector<16xf32>
    %260 = vector.multi_reduction <add>, %255, %cst_133 [1] : vector<16x32xf32> to vector<16xf32>
    %261 = vector.shape_cast %260 : vector<16xf32> to vector<16x1xf32>
    %cst_134 = arith.constant 3.200000e+01 : f32
    %262 = vector.broadcast %cst_134 : f32 to vector<16x1xf32>
    %263 = arith.divf %261, %262 : vector<16x1xf32>
    %264 = vector.broadcast %263 : vector<16x1xf32> to vector<16x32xf32>
    %265 = arith.subf %255, %264 : vector<16x32xf32>
    %266 = arith.mulf %265, %265 : vector<16x32xf32>
    %cst_135 = arith.constant dense<0.000000e+00> : vector<16xf32>
    %267 = vector.multi_reduction <add>, %266, %cst_135 [1] : vector<16x32xf32> to vector<16xf32>
    %268 = vector.shape_cast %267 : vector<16xf32> to vector<16x1xf32>
    %cst_136 = arith.constant 3.200000e+01 : f32
    %269 = vector.broadcast %cst_136 : f32 to vector<16x1xf32>
    %270 = arith.divf %268, %269 : vector<16x1xf32>
    %cst_137 = arith.constant 9.99999996E-13 : f32
    %271 = vector.broadcast %cst_137 : f32 to vector<16x1xf32>
    %272 = arith.addf %270, %271 : vector<16x1xf32>
    %273 = math.rsqrt %272 : vector<16x1xf32>
    %274 = vector.broadcast %273 : vector<16x1xf32> to vector<16x32xf32>
    %275 = arith.mulf %265, %274 : vector<16x32xf32>
    %276 = vector.broadcast %257 : vector<1x32xf32> to vector<16x32xf32>
    %277 = arith.mulf %275, %276 : vector<16x32xf32>
    %278 = vector.broadcast %259 : vector<1x32xf32> to vector<16x32xf32>
    %279 = arith.addf %277, %278 : vector<16x32xf32>
    %280 = vector.extract_strided_slice %279 {offsets = [0, 0], sizes = [1, 32], strides = [1, 1]} : vector<16x32xf32> to vector<1x32xf32>
    %281 = vector.extract_strided_slice %279 {offsets = [8, 0], sizes = [1, 32], strides = [1, 1]} : vector<16x32xf32> to vector<1x32xf32>
    %282 = tpu.concatenate %280, %281 in 0 : vector<1x32xf32>, vector<1x32xf32> -> vector<2x32xf32>
    %c0_138 = arith.constant 0 : index
    %c0_139 = arith.constant 0 : index
    %283 = vector.load %arg17[%c0_138, %c0_139] : memref<2x32xf32, #tpu.memory_space<vmem>>, vector<2x32xf32>
    tpu.vector_store %arg17[%c0_138, %c0_139], %282 {strides = array<i32>} : memref<2x32xf32, #tpu.memory_space<vmem>>, vector<2x32xf32>,
    return
  }
  func.func @transform_0(%arg0: i32) -> (i32, i32) {
    %c0_i32 = arith.constant 0 : i32
    %c0_i32_0 = arith.constant 0 : i32
    %c0_i32_1 = arith.constant 0 : i32
    return %c0_i32, %c0_i32_0 : i32, i32
  }
  func.func @transform_1(%arg0: i32) -> (i32, i32) {
    %c0_i32 = arith.constant 0 : i32
    %c0_i32_0 = arith.constant 0 : i32
    %c0_i32_1 = arith.constant 0 : i32
    return %c0_i32, %c0_i32_0 : i32, i32
  }
  func.func @transform_2(%arg0: i32) -> (i32, i32) {
    %c0_i32 = arith.constant 0 : i32
    %c0_i32_0 = arith.constant 0 : i32
    %c0_i32_1 = arith.constant 0 : i32
    return %c0_i32, %c0_i32_0 : i32, i32
  }
  func.func @transform_3(%arg0: i32) -> (i32, i32) {
    %c0_i32 = arith.constant 0 : i32
    %c0_i32_0 = arith.constant 0 : i32
    %c0_i32_1 = arith.constant 0 : i32
    return %c0_i32, %c0_i32_0 : i32, i32
  }
  func.func @transform_4(%arg0: i32) -> (i32, i32, i32) {
    %c0_i32 = arith.constant 0 : i32
    %c0_i32_0 = arith.constant 0 : i32
    %c0_i32_1 = arith.constant 0 : i32
    %c0_i32_2 = arith.constant 0 : i32
    return %c0_i32, %c0_i32_0, %c0_i32_1 : i32, i32, i32
  }
  func.func @transform_5(%arg0: i32) -> (i32, i32, i32) {
    %c0_i32 = arith.constant 0 : i32
    %c0_i32_0 = arith.constant 0 : i32
    %c0_i32_1 = arith.constant 0 : i32
    %c0_i32_2 = arith.constant 0 : i32
    return %c0_i32, %c0_i32_0, %c0_i32_1 : i32, i32, i32
  }
  func.func @transform_6(%arg0: i32) -> (i32, i32, i32) {
    %c0_i32 = arith.constant 0 : i32
    %c0_i32_0 = arith.constant 0 : i32
    %c0_i32_1 = arith.constant 0 : i32
    %c0_i32_2 = arith.constant 0 : i32
    return %c0_i32, %c0_i32_0, %c0_i32_1 : i32, i32, i32
  }
  func.func @transform_7(%arg0: i32) -> (i32, i32, i32) {
    %c0_i32 = arith.constant 0 : i32
    %c0_i32_0 = arith.constant 0 : i32
    %c0_i32_1 = arith.constant 0 : i32
    %c0_i32_2 = arith.constant 0 : i32
    return %c0_i32, %c0_i32_0, %c0_i32_1 : i32, i32, i32
  }
  func.func @transform_8(%arg0: i32) -> (i32, i32, i32) {
    %c0_i32 = arith.constant 0 : i32
    %c0_i32_0 = arith.constant 0 : i32
    %c0_i32_1 = arith.constant 0 : i32
    %c0_i32_2 = arith.constant 0 : i32
    return %c0_i32, %c0_i32_0, %c0_i32_1 : i32, i32, i32
  }
  func.func @transform_9(%arg0: i32) -> (i32, i32, i32) {
    %c0_i32 = arith.constant 0 : i32
    %c0_i32_0 = arith.constant 0 : i32
    %c0_i32_1 = arith.constant 0 : i32
    %c0_i32_2 = arith.constant 0 : i32
    return %c0_i32, %c0_i32_0, %c0_i32_1 : i32, i32, i32
  }
  func.func @transform_10(%arg0: i32) -> (i32, i32, i32) {
    %c0_i32 = arith.constant 0 : i32
    %c0_i32_0 = arith.constant 0 : i32
    %c0_i32_1 = arith.constant 0 : i32
    %c0_i32_2 = arith.constant 0 : i32
    return %c0_i32, %c0_i32_0, %c0_i32_1 : i32, i32, i32
  }
  func.func @transform_11(%arg0: i32) -> (i32, i32, i32) {
    %c0_i32 = arith.constant 0 : i32
    %c0_i32_0 = arith.constant 0 : i32
    %c0_i32_1 = arith.constant 0 : i32
    %c0_i32_2 = arith.constant 0 : i32
    return %c0_i32, %c0_i32_0, %c0_i32_1 : i32, i32, i32
  }
  func.func @transform_12(%arg0: i32) -> (i32, i32, i32) {
    %c0_i32 = arith.constant 0 : i32
    %c0_i32_0 = arith.constant 0 : i32
    %c0_i32_1 = arith.constant 0 : i32
    %c0_i32_2 = arith.constant 0 : i32
    return %c0_i32, %c0_i32_0, %c0_i32_1 : i32, i32, i32
  }
  func.func @transform_13(%arg0: i32) -> (i32, i32, i32) {
    %c0_i32 = arith.constant 0 : i32
    %c0_i32_0 = arith.constant 0 : i32
    %c0_i32_1 = arith.constant 0 : i32
    %c0_i32_2 = arith.constant 0 : i32
    return %c0_i32, %c0_i32_0, %c0_i32_1 : i32, i32, i32
  }
  func.func @transform_14(%arg0: i32) -> (i32, i32, i32) {
    %c0_i32 = arith.constant 0 : i32
    %c0_i32_0 = arith.constant 0 : i32
    %c0_i32_1 = arith.constant 0 : i32
    %c0_i32_2 = arith.constant 0 : i32
    return %c0_i32, %c0_i32_0, %c0_i32_1 : i32, i32, i32
  }
  func.func @transform_15(%arg0: i32) -> (i32, i32, i32) {
    %c0_i32 = arith.constant 0 : i32
    %c0_i32_0 = arith.constant 0 : i32
    %c0_i32_1 = arith.constant 0 : i32
    %c0_i32_2 = arith.constant 0 : i32
    return %c0_i32, %c0_i32_0, %c0_i32_1 : i32, i32, i32
  }
  func.func @transform_16(%arg0: i32) -> (i32, i32) {
    %c0_i32 = arith.constant 0 : i32
    %c0_i32_0 = arith.constant 0 : i32
    %c0_i32_1 = arith.constant 0 : i32
    return %c0_i32, %c0_i32_0 : i32, i32
  }
}

</mosaic_0001>

<bundles_post_ra>
// kernel: bioclinicalbert_ft_forward.1
= control target key start
LH: loop header
LB: loop body
LE: loop exit
PB: predicated region body
PF: predicated region fallthrough
CT: control target
= control target key end

     0   :  { %s2952_s0 = inlined_call_operand.vmem [shape: f32[16,32], index: 0, kind: input, shape index: {}]   ;;  %s2953_s1 = inlined_call_operand.vmem [shape: f32[16,16], index: 1, kind: input, shape index: {}]   ;;  %s2954_s2 = inlined_call_operand.vmem [shape: f32[1,32], index: 2, kind: input, shape index: {}]   ;;  %s2955_s3 = inlined_call_operand.vmem [shape: f32[1,32], index: 3, kind: input, shape index: {}]   ;;  %s2956_s4 = inlined_call_operand.vmem [shape: f32[2,32,96], index: 4, kind: input, shape index: {}]   ;;  %s2957_s5 = inlined_call_operand.vmem [shape: f32[2,1,96], index: 5, kind: input, shape index: {}]   ;;  %s2958_s6 = inlined_call_operand.vmem [shape: f32[2,32,32], index: 6, kind: input, shape index: {}]   ;;  %s2959_s7 = inlined_call_operand.vmem [shape: f32[2,1,32], index: 7, kind: input, shape index: {}]   ;;  %s2960_s8 = inlined_call_operand.vmem [shape: f32[2,1,32], index: 8, kind: input, shape index: {}]   ;;  %s2961_s9 = inlined_call_operand.vmem [shape: f32[2,1,32], index: 9, kind: input, shape index: {}]   ;;  %s2962_s10 = inlined_call_operand.vmem [shape: f32[2,32,64], index: 10, kind: input, shape index: {}]   ;;  %s2963_s11 = inlined_call_operand.vmem [shape: f32[2,1,64], index: 11, kind: input, shape index: {}]   ;;  %s2964_s12 = inlined_call_operand.vmem [shape: f32[2,64,32], index: 12, kind: input, shape index: {}]   ;;  %s2965_s13 = inlined_call_operand.vmem [shape: f32[2,1,32], index: 13, kind: input, shape index: {}]   ;;  %s2966_s14 = inlined_call_operand.vmem [shape: f32[2,1,32], index: 14, kind: input, shape index: {}]   ;;  %s2967_s15 = inlined_call_operand.vmem [shape: f32[2,1,32], index: 15, kind: input, shape index: {}]   ;;  %s2968_s16 = inlined_call_operand.hbm [shape: f32[2,32], index: 16, kind: output, shape index: {}]  }
   0x1   :  { %2970 = sst [smem:[#allocation5_spill]] %s2952_s0 }
   0x2   :  { %s2971_s23 = sld [smem:[#allocation5_spill]]  ;;  %vm60_vm0 = vcmask 261120  }
   0x8   :  { %v56_v0 = vld [vmem:[%s2971_s23] sm:$0xff]  ;;  %v57_v1 = vld [vmem:[%s2971_s23 + $0x8] sm:$0xff] }
   0x9   :  { %21 = vsyncpa [#allocation3], 0  ;;  %v61_v2 = vsel %vm60_vm0, %v56_v0, 0.0  ;;  %v64_v3 = vsel %vm60_vm0, %v57_v1, 0.0  ;;  %v104_v14 = vld [vmem:[%s2956_s4] sm:$0xff]  ;;  %v105_v15 = vld [vmem:[%s2956_s4 + $0x8] sm:$0xff] }
   0xa   :  { %62 = vadd.xlane.f32.xlu0 %v61_v2  ;;  %v106_v16 = vld [vmem:[%s2956_s4 + $0x10] sm:$0xff]  ;;  %v2261_v17 = vpack.c.bf16 %v105_v15, %v104_v14  ;;  %v107_v18 = vld [vmem:[%s2956_s4 + $0x18] sm:$0xff]  ;;  %v1927_v27 = vld [vmem:[%s2954_s2] ss:$0 sm:$0xff]  ;;  %vm204_vm1 = vcmask 130048   ;;  %s2513_s24 = smov 96  }
   0xb   :  { %v2265_v19 = vpack.c.bf16 %v107_v18, %v106_v16  ;;  %v1928_v29 = vld [vmem:[%s2955_s3] ss:$0 sm:$0xff]  ;;  %s2512_s3 = smov 80   ;;  %s2514_s25 = smov 112   ;;  %vm2654_vm2 = vmpackc.low %vm204_vm1, %vm204_vm1  ;;  %v2672_v55 = vld [vmem:[%s2953_s1 + $0x8] sm:$0xff]  ;;  %vm872_vm3 = vcmask 523264  }
   0xc   :  { %2262 = vmatprep.subr.bf16.mxu1 %v2261_v17  ;;  %v1929_v36 = vld [vmem:[%s2957_s5] ss:$0 sm:$0xff]  ;;  %s2516_s30 = smov 64   ;;  %s2517_s23 = smov 16   ;;  %vm1909_vm4 = vcmask 1040384   ;;  %vm1911_vm5 = vcmask 254976  }
   0xd   :  { %2264 = vmatpush3.bf16.msra.mxu1 %v2261_v17  ;;  %v2677_v56 = vld [vmem:[%s2953_s1] sm:$0xff]  ;;  %s2515_s1 = smov 48  }
   0xe   :  { %65 = vadd.xlane.f32.xlu0 %v64_v3  ;;  %2266 = vmatprep.subr.bf16.mxu1 %v2265_v19 }
  0x11   :  { %2268 = vmatpush3.bf16.msra.mxu1 %v2265_v19 }
  0x97   :  { %v63_v4 = vpop.xlane.xlu0 %62 }
  0x98   :  { %v68_v5 = vmul.f32 0.03125, %v63_v4 }
  0x9a   :  { %v70_v6 = vsub.f32 %v56_v0, %v68_v5 }
  0x9b   :  { %v66_v7 = vpop.xlane.xlu0 %65 }
  0x9c   :  { %v69_v8 = vmul.f32 0.03125, %v66_v7  ;;  %v72_v9 = vmul.f32 %v70_v6, %v70_v6 }
  0x9e   :  { %v71_v10 = vsub.f32 %v57_v1, %v69_v8  ;;  %v74_v11 = vsel %vm60_vm0, %v72_v9, 0.0 }
  0x9f   :  { %75 = vadd.xlane.f32.xlu1 %v74_v11 }
  0xa0   :  { %v73_v12 = vmul.f32 %v71_v10, %v71_v10 }
  0xa2   :  { %v77_v13 = vsel %vm60_vm0, %v73_v12, 0.0 }
  0xa3   :  { %78 = vadd.xlane.f32.xlu1 %v77_v13 }
 0x12c   :  { %v76_v20 = vpop.xlane.xlu1 %75 }
 0x12d   :  { %v80_v21 = vmul.f32 0.03125, %v76_v20 }
 0x12f   :  { %v82_v22 = vadd.f32 1e-12, %v80_v21 }
 0x130   :  { %v79_v23 = vpop.xlane.xlu1 %78 }
 0x131   :  { %2428 = vrsqrt.f32 %v82_v22  ;;  %v81_v24 = vmul.f32 0.03125, %v79_v23 }
 0x133   :  { %v83_v25 = vadd.f32 1e-12, %v81_v24 }
 0x135   :  { %2430 = vrsqrt.f32 %v83_v25 }
 0x13b   :  { %v2429_v26 = vpop.eup %2428 }
 0x13c   :  { %v86_v28 = vmul.f32 %v2429_v26, %v70_v6 }
 0x13e   :  { %v94_v30 = vmul.f32 %v1927_v27, %v86_v28 }
 0x13f   :  { %v2431_v31 = vpop.eup %2430 }
 0x140   :  { %v87_v32 = vmul.f32 %v2431_v31, %v71_v10  ;;  %v2632_v33 = vadd.f32 %v1928_v29, %v94_v30 }
 0x142   :  { %v95_v34 = vmul.f32 %v1927_v27, %v87_v32  ;;  %2109 = vmatprep.mubr.msk.f32.mxu1 %vm60_vm0, %v2632_v33 }
 0x144   :  { %v2636_v35 = vadd.f32 %v1928_v29, %v95_v34 }
 0x146   :  { %2110 = vmatmul.mubr.msk.f32.vlgmr.msra.gmra.mrb[0].mxu1 %vm60_vm0, %v2636_v35 }
 0x219   :  { %v2111_v37 = vpop.f32.mrb[0].mxu1 }
 0x21a   :  { %v193_v38 = vadd.f32 %v2111_v37, %v1929_v36  ;;  %v187_v39 = vpop.f32.mrb[1].mxu1 }
 0x21b   :  { %v188_v40 = vadd.f32 %v1929_v36, %v187_v39 }
 0x21c   :  { %v197_v43 = vmul.f32 0.25, %v193_v38 }
 0x21d   :  { %v2643_v41 = vpack.i.bf16 %v193_v38, %v188_v40  ;;  %v196_v42 = vmul.f32 0.25, %v188_v40 }
 0x21f   :  { %2394 = vrot.lane.b32.xlu1 %v2643_v41, %s2512_s3  ;;  %2389 = vrot.lane.b32.xlu0 %v2643_v41, %s2513_s24 }
 0x220   :  { %2116 = vmatprep.mubr.msk.f32.mxu1 %vm204_vm1, %v196_v42 }
 0x223   :  { %399 = vrot.lane.b32.xlu1 %v196_v42, %s2514_s25 }
 0x227   :  { %401 = vrot.lane.b32.xlu1 %v197_v43, %s2514_s25 }
 0x291   :  { %v2395_v44 = vpop.permute.xlu1 %2394  ;;  %v2390_v45 = vpop.permute.xlu0 %2389 }
 0x292   :  { %v2397_v46 = vunpack.i.h.bf16 %v2395_v44  ;;  %v2396_v47 = vunpack.i.l.bf16 %v2395_v44  ;;  %v2392_v48 = vunpack.i.h.bf16 %v2390_v45  ;;  %v2391_v49 = vunpack.i.l.bf16 %v2390_v45 }
 0x294   :  { %v2269_v51 = vpack.c.bf16 %v2392_v48, %v2391_v49  ;;  %v2279_v52 = vpack.c.bf16 %v2397_v46, %v2396_v47  ;;  %v609_v47 = vld [vmem:[%s2958_s6] sm:$0xff]  ;;  %v610_v48 = vld [vmem:[%s2958_s6 + $0x8] sm:$0xff] }
 0x295   :  { %v400_v53 = vpop.permute.xlu1 %399  ;;  %v2289_v49 = vpack.c.bf16 %v610_v48, %v609_v47  ;;  %v861_v47 = vld [vmem:[%s2964_s12 + $0x20] sm:$0xff]  ;;  %v862_v48 = vld [vmem:[%s2964_s12 + $0x28] sm:$0xff] }
 0x296   :  { %2271 = vmatprep.subr.msk.bf16.mxu1 %vm2654_vm2, %v2269_v51 }
 0x297   :  { %2274 = vmatpush3.bf16.xpose.msk.msra.mxu1 %vm2654_vm2, %v2269_v51  ;;  %v611_v51 = vld [vmem:[%s2958_s6 + $0x10] sm:$0xff] }
 0x298   :  { %2281 = vmatprep.subr.msk.bf16.mxu1 %vm2654_vm2, %v2279_v52 }
 0x299   :  { %v402_v54 = vpop.permute.xlu1 %401 }
 0x29e   :  { %2117 = vmatmul.mubr.msk.f32.vlgmr.msra.gmra.mrb[2].mxu1 %vm204_vm1, %v197_v43 }
 0x29f   :  { %2284 = vmatpush3.bf16.xpose.msk.msra.mxu1 %vm2654_vm2, %v2279_v52  ;;  %2130 = vmatprep.mubr.msk.f32.mxu1 %vm204_vm1, %v400_v53  ;;  %v612_v52 = vld [vmem:[%s2958_s6 + $0x18] sm:$0xff] }
 0x2a0   :  { %v2293_v53 = vpack.c.bf16 %v612_v52, %v611_v51  ;;  %v863_v51 = vld [vmem:[%s2964_s12 + $0x30] sm:$0xff]  ;;  %v864_v52 = vld [vmem:[%s2964_s12 + $0x38] sm:$0xff] }
 0x2a6   :  { %2131 = vmatmul.mubr.msk.f32.vlgmr.msra.gmra.mrb[4].mxu1 %vm204_vm1, %v402_v54 }
 0x371   :  { %v2118_v57 = vpop.f32.mrb[2].mxu1 }
 0x372   :  { %v287_v58 = vadd.f32 %v2118_v57, %v2672_v55  ;;  %v281_v59 = vpop.f32.mrb[3].mxu1 }
 0x373   :  { %v282_v60 = vadd.f32 %v281_v59, %v2677_v56 }
 0x374   :  { %v293_v61 = vsel %vm204_vm1, %v287_v58, -inf }
 0x375   :  { %294 = vmax.xlane.f32.xlu1 %v293_v61  ;;  %v290_v62 = vsel %vm204_vm1, %v282_v60, -inf }
 0x376   :  { %291 = vmax.xlane.f32.xlu0 %v290_v62 }
 0x379   :  { %v2132_v63 = vpop.f32.mrb[4].mxu1 }
 0x37a   :  { %v481_v0 = vpop.f32.mrb[5].mxu1  ;;  %v487_v2 = vadd.f32 %v2132_v63, %v2672_v55 }
 0x37b   :  { %v482_v1 = vadd.f32 %v481_v0, %v2677_v56  ;;  %v1944_v0 = vld [vmem:[%s2959_s7] ss:$0 sm:$0xff] }
 0x37c   :  { %v493_v4 = vsel %vm204_vm1, %v487_v2, -inf }
 0x37d   :  { %v490_v3 = vsel %vm204_vm1, %v482_v1, -inf }
 0x37e   :  { %491 = vmax.xlane.f32.xlu0 %v490_v3 }
 0x382   :  { %494 = vmax.xlane.f32.xlu0 %v493_v4 }
 0x402   :  { %v295_v5 = vpop.xlane.xlu1 %294 }
 0x403   :  { %v297_v6 = vsub.f32 %v287_v58, %v295_v5  ;;  %v292_v7 = vpop.xlane.xlu0 %291 }
 0x404   :  { %v296_v8 = vsub.f32 %v282_v60, %v292_v7 }
 0x405   :  { %v300_v9 = vmul.f32 1.442695, %v297_v6 }
 0x406   :  { %v298_v10 = vmul.f32 1.442695, %v296_v8 }
 0x407   :  { %2432 = vpow2.f32 %v300_v9 }
 0x408   :  { %2434 = vpow2.f32 %v298_v10 }
 0x40b   :  { %v492_v11 = vpop.xlane.xlu0 %491 }
 0x40c   :  { %v496_v12 = vsub.f32 %v482_v1, %v492_v11 }
 0x40e   :  { %v498_v13 = vmul.f32 1.442695, %v496_v12 }
 0x40f   :  { %v495_v14 = vpop.xlane.xlu0 %494 }
 0x410   :  { %2436 = vpow2.f32 %v498_v13  ;;  %v497_v15 = vsub.f32 %v487_v2, %v495_v14 }
 0x411   :  { %v2433_v16 = vpop.eup %2432 }
 0x412   :  { %v2435_v17 = vpop.eup %2434  ;;  %v500_v18 = vmul.f32 1.442695, %v497_v15  ;;  %v305_v19 = vsel %vm204_vm1, %v2433_v16, 0.0 }
 0x413   :  { %306 = vadd.xlane.f32.xlu1 %v305_v19  ;;  %v302_v20 = vsel %vm204_vm1, %v2435_v17, 0.0 }
 0x414   :  { %2438 = vpow2.f32 %v500_v18  ;;  %303 = vadd.xlane.f32.xlu0 %v302_v20  ;;  %v748_v18 = vld [vmem:[%s2962_s10 + $0x8] sm:$0xff]  ;;  %v749_v20 = vld [vmem:[%s2962_s10 + $0x10] sm:$0xff] }
 0x41a   :  { %v2437_v21 = vpop.eup %2436 }
 0x41b   :  { %v502_v22 = vsel %vm204_vm1, %v2437_v21, 0.0 }
 0x41c   :  { %503 = vadd.xlane.f32.xlu0 %v502_v22 }
 0x41e   :  { %v2439_v23 = vpop.eup %2438 }
 0x41f   :  { %v505_v24 = vsel %vm204_vm1, %v2439_v23, 0.0 }
 0x420   :  { %506 = vadd.xlane.f32.xlu1 %v505_v24 }
 0x431   :  { %2404 = vrot.lane.b32.xlu1 %v2643_v41, %s2515_s1 }
 0x432   :  { %2399 = vrot.lane.b32.xlu0 %v2643_v41, %s2516_s30 }
 0x4a0   :  { %v307_v26 = vpop.xlane.xlu1 %306 }
 0x4a1   :  { %v304_v25 = vpop.xlane.xlu0 %303 }
 0x4a2   :  { %2440 = vrcp.f32 %v304_v25 }
 0x4a3   :  { %2442 = vrcp.f32 %v307_v26 }
 0x4a9   :  { %v504_v27 = vpop.xlane.xlu0 %503 }
 0x4aa   :  { %2444 = vrcp.f32 %v504_v27 }
 0x4ac   :  { %v2441_v28 = vpop.eup %2440 }
 0x4ad   :  { %v2400_v29 = vpop.permute.xlu0 %2399  ;;  %v507_v30 = vpop.xlane.xlu1 %506  ;;  %v310_v31 = vmul.f32 %v2441_v28, %v2435_v17 }
 0x4ae   :  { %v2402_v32 = vunpack.i.h.bf16 %v2400_v29  ;;  %v2401_v34 = vunpack.i.l.bf16 %v2400_v29  ;;  %2446 = vrcp.f32 %v507_v30  ;;  %v2443_v37 = vpop.eup %2442  ;;  %v1947_v30 = vld [vmem:[%s2960_s8] ss:$0 sm:$0xff] }
 0x4af   :  { %2123 = vmatprep.mubr.msk.f32.mxu0 %vm204_vm1, %v310_v31  ;;  %v311_v43 = vmul.f32 %v2443_v37, %v2433_v16 }
 0x4b0   :  { %v2275_v36 = vpack.c.bf16 %v2402_v32, %v2401_v34  ;;  %v1948_v32 = vld [vmem:[%s2961_s9] ss:$0 sm:$0xff] }
 0x4b1   :  { %v2405_v38 = vpop.permute.xlu1 %2404 }
 0x4b2   :  { %v2407_v39 = vunpack.i.h.bf16 %v2405_v38  ;;  %v2406_v40 = vunpack.i.l.bf16 %v2405_v38  ;;  %2276 = vmatprep.subr.bf16.mxu0 %v2275_v36 }
 0x4b3   :  { %2278 = vmatpush3.bf16.msra.mxu0 %v2275_v36 }
 0x4b4   :  { %v2445_v41 = vpop.eup %2444  ;;  %v2285_v42 = vpack.c.bf16 %v2407_v39, %v2406_v40 }
 0x4b5   :  { %v510_v44 = vmul.f32 %v2445_v41, %v2437_v21  ;;  %v750_v21 = vld [vmem:[%s2962_s10 + $0x18] sm:$0xff]  ;;  %v857_v41 = vld [vmem:[%s2964_s12] sm:$0xff] }
 0x4b6   :  { %2124 = vmatmul.mubr.msk.f32.vlgmr.msra.gmra.mrb[0].mxu0 %vm204_vm1, %v311_v43  ;;  %2286 = vmatprep.subr.bf16.mxu0 %v2285_v42  ;;  %v2301_v22 = vpack.c.bf16 %v750_v21, %v749_v20 }
 0x4b7   :  { %2288 = vmatpush3.bf16.msra.mxu0 %v2285_v42  ;;  %2137 = vmatprep.mubr.msk.f32.mxu0 %vm204_vm1, %v510_v44  ;;  %v858_v42 = vld [vmem:[%s2964_s12 + $0x8] sm:$0xff]  ;;  %v859_v44 = vld [vmem:[%s2964_s12 + $0x10] sm:$0xff] }
 0x4b8   :  { %v2447_v45 = vpop.eup %2446  ;;  %2290 = vmatprep.subr.bf16.mxu0 %v2289_v49  ;;  %v2305_v43 = vpack.c.bf16 %v858_v42, %v857_v41 }
 0x4b9   :  { %v511_v46 = vmul.f32 %v2447_v45, %v2439_v23  ;;  %v860_v45 = vld [vmem:[%s2964_s12 + $0x18] sm:$0xff] }
 0x4bb   :  { %2138 = vmatmul.mubr.msk.f32.vlgmr.msra.gmra.mrb[2].mxu0 %vm204_vm1, %v511_v46  ;;  %v2309_v46 = vpack.c.bf16 %v860_v45, %v859_v44 }
 0x4bc   :  { %2292 = vmatpush3.bf16.msra.mxu0 %v2289_v49  ;;  %v2313_v49 = vpack.c.bf16 %v862_v48, %v861_v47  ;;  %v1955_v47 = vld [vmem:[%s2966_s14] ss:$0 sm:$0xff] }
 0x4bd   :  { %2294 = vmatprep.subr.bf16.mxu0 %v2293_v53 }
 0x4c0   :  { %2296 = vmatpush3.bf16.msra.mxu0 %v2293_v53  ;;  %v2317_v53 = vpack.c.bf16 %v864_v52, %v863_v51  ;;  %v1956_v52 = vld [vmem:[%s2967_s15] ss:$0 sm:$0xff] }
 0x4c1   :  { %2306 = vmatprep.subr.bf16.mxu0 %v2305_v43 }
 0x589   :  { %v2125_v54 = vpop.f32.mrb[0].mxu0 }
 0x58a   :  { %v390_v57 = vpop.f32.mrb[1].mxu0 }
 0x58e   :  { %v2139_v58 = vpop.f32.mrb[2].mxu0 }
 0x58f   :  { %v590_v59 = vpop.f32.mrb[3].mxu0 }
 0x590   :  { %601 = vrot.lane.b32.xlu1 %v590_v59, %s2517_s23 }
 0x594   :  { %603 = vrot.lane.b32.xlu1 %v2139_v58, %s2517_s23 }
 0x602   :  { %v602_v60 = vpop.permute.xlu1 %601 }
 0x603   :  { %v607_v61 = vsel %vm204_vm1, %v390_v57, %v602_v60 }
 0x604   :  { %2148 = vmatprep.mubr.msk.f32.mxu0 %vm60_vm0, %v607_v61 }
 0x606   :  { %v604_v62 = vpop.permute.xlu1 %603 }
 0x607   :  { %v608_v63 = vsel %vm204_vm1, %v2125_v54, %v604_v62  ;;  %v1949_v54 = vld [vmem:[%s2963_s11] ss:$0 sm:$0xff] }
 0x608   :  { %2149 = vmatmul.mubr.msk.f32.vlgmr.msra.gmra.mrb[4].mxu0 %vm60_vm0, %v608_v63 }
 0x609   :  { %2308 = vmatpush3.bf16.msra.mxu0 %v2305_v43 }
 0x60a   :  { %2310 = vmatprep.subr.bf16.mxu0 %v2309_v46 }
 0x60d   :  { %2312 = vmatpush3.bf16.msra.mxu0 %v2309_v46 }
 0x60e   :  { %2314 = vmatprep.subr.bf16.mxu0 %v2313_v49 }
 0x611   :  { %2316 = vmatpush3.bf16.msra.mxu0 %v2313_v49 }
 0x612   :  { %2318 = vmatprep.subr.bf16.mxu0 %v2317_v53 }
 0x615   :  { %2320 = vmatpush3.bf16.msra.mxu0 %v2317_v53 }
 0x6db   :  { %v2150_v1 = vpop.f32.mrb[4].mxu0 }
 0x6dc   :  { %v698_v2 = vadd.f32 %v2150_v1, %v1944_v0  ;;  %v692_v3 = vpop.f32.mrb[5].mxu0 }
 0x6dd   :  { %v693_v4 = vadd.f32 %v1944_v0, %v692_v3 }
 0x6de   :  { %v702_v5 = vadd.f32 %v698_v2, %v2636_v35 }
 0x6df   :  { %v701_v6 = vadd.f32 %v693_v4, %v2632_v33  ;;  %v747_v33 = vld [vmem:[%s2962_s10] sm:$0xff] }
 0x6e0   :  { %v708_v7 = vsel %vm60_vm0, %v702_v5, 0.0  ;;  %v2297_v19 = vpack.c.bf16 %v748_v18, %v747_v33 }
 0x6e1   :  { %709 = vadd.xlane.f32.xlu1 %v708_v7  ;;  %v705_v8 = vsel %vm60_vm0, %v701_v6, 0.0 }
 0x6e2   :  { %706 = vadd.xlane.f32.xlu0 %v705_v8  ;;  %2298 = vmatprep.subr.bf16.mxu1 %v2297_v19 }
 0x6e3   :  { %2300 = vmatpush3.bf16.msra.mxu1 %v2297_v19 }
 0x6e4   :  { %2302 = vmatprep.subr.bf16.mxu1 %v2301_v22 }
 0x6e7   :  { %2304 = vmatpush3.bf16.msra.mxu1 %v2301_v22 }
 0x76e   :  { %v710_v9 = vpop.xlane.xlu1 %709 }
 0x76f   :  { %v712_v10 = vmul.f32 0.03125, %v710_v9  ;;  %v707_v11 = vpop.xlane.xlu0 %706 }
 0x770   :  { %v711_v12 = vmul.f32 0.03125, %v707_v11 }
 0x771   :  { %v714_v13 = vsub.f32 %v702_v5, %v712_v10 }
 0x772   :  { %v713_v14 = vsub.f32 %v701_v6, %v711_v12 }
 0x773   :  { %v716_v17 = vmul.f32 %v714_v13, %v714_v13 }
 0x774   :  { %v715_v15 = vmul.f32 %v713_v14, %v713_v14 }
 0x775   :  { %v720_v35 = vsel %vm60_vm0, %v716_v17, 0.0 }
 0x776   :  { %v717_v16 = vsel %vm60_vm0, %v715_v15, 0.0  ;;  %v1952_v15 = vld [vmem:[%s2965_s13] ss:$0 sm:$0xff] }
 0x777   :  { %718 = vadd.xlane.f32.xlu0 %v717_v16 }
 0x77b   :  { %721 = vadd.xlane.f32.xlu0 %v720_v35 }
 0x804   :  { %v719_v23 = vpop.xlane.xlu0 %718 }
 0x805   :  { %v723_v24 = vmul.f32 0.03125, %v719_v23 }
 0x807   :  { %v725_v25 = vadd.f32 1e-12, %v723_v24 }
 0x808   :  { %v722_v26 = vpop.xlane.xlu0 %721 }
 0x809   :  { %2448 = vrsqrt.f32 %v725_v25  ;;  %v724_v27 = vmul.f32 0.03125, %v722_v26 }
 0x80b   :  { %v726_v28 = vadd.f32 1e-12, %v724_v27 }
 0x80d   :  { %2450 = vrsqrt.f32 %v726_v28 }
 0x813   :  { %v2449_v29 = vpop.eup %2448 }
 0x814   :  { %v729_v31 = vmul.f32 %v2449_v29, %v713_v14 }
 0x816   :  { %v737_v34 = vmul.f32 %v1947_v30, %v729_v31 }
 0x817   :  { %v2451_v36 = vpop.eup %2450 }
 0x818   :  { %v730_v37 = vmul.f32 %v2451_v36, %v714_v13  ;;  %v745_v38 = vadd.f32 %v1948_v32, %v737_v34  ;;  %v1958_v34 = vld [vmem:[%s2956_s4 + $0x28] sm:$0xff] }
 0x81a   :  { %v738_v39 = vmul.f32 %v1947_v30, %v730_v37  ;;  %2159 = vmatprep.mubr.msk.f32.mxu1 %vm60_vm0, %v745_v38  ;;  %v1959_v37 = vld [vmem:[%s2956_s4 + $0x30] sm:$0xff] }
 0x81c   :  { %v746_v40 = vadd.f32 %v1948_v32, %v738_v39  ;;  %v1957_v32 = vld [vmem:[%s2956_s4 + $0x20] sm:$0xff] }
 0x81d   :  { %v2321_v36 = vpack.c.bf16 %v1958_v34, %v1957_v32 }
 0x81e   :  { %2160 = vmatmul.mubr.msk.f32.vlgmr.msra.gmra.mrb[6].mxu1 %vm60_vm0, %v746_v40 }
 0x81f   :  { %2322 = vmatprep.subr.bf16.mxu1 %v2321_v36 }
 0x820   :  { %2324 = vmatpush3.bf16.msra.mxu1 %v2321_v36 }
 0x8f1   :  { %v2161_v57 = vpop.f32.mrb[6].mxu1 }
 0x8f2   :  { %v836_v58 = vadd.f32 %v2161_v57, %v1949_v54  ;;  %v830_v59 = vpop.f32.mrb[7].mxu1 }
 0x8f3   :  { %v831_v60 = vadd.f32 %v1949_v54, %v830_v59  ;;  %v1962_v59 = vld [vmem:[%s2957_s5 + $0x1] ss:$0 sm:$0xff] }
 0x8f4   :  { %v840_v61 = vmul.f32 %v836_v58, %v836_v58 }
 0x8f5   :  { %v839_v62 = vmul.f32 %v831_v60, %v831_v60 }
 0x8f6   :  { %v842_v63 = vmul.f32 %v840_v61, %v836_v58 }
 0x8f7   :  { %v841_v0 = vmul.f32 %v839_v62, %v831_v60 }
 0x8f8   :  { %v844_v1 = vmul.f32 0.044715, %v842_v63 }
 0x8f9   :  { %v843_v2 = vmul.f32 0.044715, %v841_v0 }
 0x8fa   :  { %v846_v3 = vadd.f32 %v844_v1, %v836_v58 }
 0x8fb   :  { %v845_v4 = vadd.f32 %v843_v2, %v831_v60 }
 0x8fc   :  { %v848_v5 = vmul.f32 0.7978846, %v846_v3 }
 0x8fd   :  { %v847_v6 = vmul.f32 0.7978846, %v845_v4 }
 0x8fe   :  { %2452 = vtanh.f32 %v848_v5 }
 0x8ff   :  { %2454 = vtanh.f32 %v847_v6 }
 0x908   :  { %v2453_v7 = vpop.eup %2452 }
 0x909   :  { %v2455_v8 = vpop.eup %2454  ;;  %v852_v9 = vadd.f32 1.0, %v2453_v7 }
 0x90a   :  { %v851_v10 = vadd.f32 1.0, %v2455_v8 }
 0x90b   :  { %v854_v11 = vmul.f32 0.5, %v852_v9 }
 0x90c   :  { %v853_v12 = vmul.f32 0.5, %v851_v10 }
 0x90d   :  { %v856_v14 = vmul.f32 %v854_v11, %v836_v58 }
 0x90e   :  { %v855_v13 = vmul.f32 %v853_v12, %v831_v60 }
 0x910   :  { %2178 = vmatprep.mubr.msk.f32.mxu0 %vm872_vm3, %v855_v13 }
 0x911   :  { %2179 = vmatmul.mubr.msk.f32.vlgmr.msra.gmra.mrb[6].mxu0 %vm872_vm3, %v856_v14 }
 0x9e4   :  { %v2180_v16 = vpop.f32.mrb[6].mxu0 }
 0x9e5   :  { %v951_v17 = vadd.f32 %v2180_v16, %v1952_v15  ;;  %v945_v35 = vpop.f32.mrb[7].mxu0 }
 0x9e6   :  { %v946_v33 = vadd.f32 %v1952_v15, %v945_v35 }
 0x9e7   :  { %v955_v18 = vadd.f32 %v951_v17, %v746_v40 }
 0x9e8   :  { %v954_v19 = vadd.f32 %v946_v33, %v745_v38  ;;  %v1960_v38 = vld [vmem:[%s2956_s4 + $0x38] sm:$0xff]  ;;  %s2518_s4 = smov [#allocation2]  }
 0x9e9   :  { %v961_v20 = vsel %vm60_vm0, %v955_v18, 0.0  ;;  %v2325_v39 = vpack.c.bf16 %v1960_v38, %v1959_v37  ;;  %s1919_s20 = sshll.u32 %s2518_s4, 4  ;;  %s1920_s20 = int_to_ptr.vmem [resolvable:$true] %s1919_s20 }
 0x9ea   :  { %962 = vadd.xlane.f32.xlu1 %v961_v20  ;;  %v958_v21 = vsel %vm60_vm0, %v954_v19, 0.0  ;;  %p2493_p1 = scmp.lt.s32.totalorder %s1920_s20, %s1920_s20 }
 0x9eb   :  { %959 = vadd.xlane.f32.xlu0 %v958_v21  ;;  %2326 = vmatprep.subr.bf16.mxu1 %v2325_v39 }
 0x9ec   :  { %2328 = vmatpush3.bf16.msra.mxu1 %v2325_v39 }
 0xa77   :  { %v963_v22 = vpop.xlane.xlu1 %962 }
 0xa78   :  { %v965_v23 = vmul.f32 0.03125, %v963_v22  ;;  %v960_v24 = vpop.xlane.xlu0 %959 }
 0xa79   :  { %v964_v25 = vmul.f32 0.03125, %v960_v24 }
 0xa7a   :  { %v967_v26 = vsub.f32 %v955_v18, %v965_v23 }
 0xa7b   :  { %v966_v27 = vsub.f32 %v954_v19, %v964_v25 }
 0xa7c   :  { %v969_v28 = vmul.f32 %v967_v26, %v967_v26 }
 0xa7d   :  { %v968_v29 = vmul.f32 %v966_v27, %v966_v27 }
 0xa7e   :  { %v973_v30 = vsel %vm60_vm0, %v969_v28, 0.0 }
 0xa7f   :  { %974 = vadd.xlane.f32.xlu1 %v973_v30  ;;  %v970_v31 = vsel %vm60_vm0, %v968_v29, 0.0 }
 0xa80   :  { %971 = vadd.xlane.f32.xlu0 %v970_v31 }
 0xb0c   :  { %v975_v40 = vpop.xlane.xlu1 %974 }
 0xb0d   :  { %v977_v41 = vmul.f32 0.03125, %v975_v40  ;;  %v972_v42 = vpop.xlane.xlu0 %971 }
 0xb0e   :  { %v976_v43 = vmul.f32 0.03125, %v972_v42 }
 0xb0f   :  { %v979_v44 = vadd.f32 1e-12, %v977_v41 }
 0xb10   :  { %v978_v45 = vadd.f32 1e-12, %v976_v43 }
 0xb11   :  { %2456 = vrsqrt.f32 %v979_v44 }
 0xb12   :  { %2458 = vrsqrt.f32 %v978_v45 }
 0xb1b   :  { %v2457_v46 = vpop.eup %2456 }
 0xb1c   :  { %v2459_v48 = vpop.eup %2458  ;;  %v983_v49 = vmul.f32 %v2457_v46, %v967_v26 }
 0xb1d   :  { %v982_v51 = vmul.f32 %v2459_v48, %v966_v27 }
 0xb1e   :  { %v991_v53 = vmul.f32 %v1955_v47, %v983_v49 }
 0xb1f   :  { %v990_v54 = vmul.f32 %v1955_v47, %v982_v51 }
 0xb20   :  { %v2802_v58 = vadd.f32 %v1956_v52, %v991_v53 }
 0xb21   :  { %v2800_v57 = vadd.f32 %v1956_v52, %v990_v54 }
 0xb23   :  { %2189 = vmatprep.mubr.msk.f32.mxu1 %vm60_vm0, %v2800_v57 }
 0xb24   :  { %2190 = vmatmul.mubr.msk.f32.vlgmr.msra.gmra.mrb[8].mxu1 %vm60_vm0, %v2802_v58 }
 0xbf7   :  { %v2191_v60 = vpop.f32.mrb[8].mxu1 }
 0xbf8   :  { %v1091_v61 = vadd.f32 %v2191_v60, %v1962_v59  ;;  %v1085_v62 = vpop.f32.mrb[9].mxu1 }
 0xbf9   :  { %v1086_v63 = vadd.f32 %v1962_v59, %v1085_v62 }
 0xbfa   :  { %v1095_v2 = vmul.f32 0.25, %v1091_v61 }
 0xbfb   :  { %v2811_v0 = vpack.i.bf16 %v1091_v61, %v1086_v63  ;;  %v1094_v1 = vmul.f32 0.25, %v1086_v63 }
 0xbfd   :  { %2414 = vrot.lane.b32.xlu1 %v2811_v0, %s2512_s3  ;;  %2409 = vrot.lane.b32.xlu0 %v2811_v0, %s2513_s24 }
 0xbfe   :  { %2196 = vmatprep.mubr.msk.f32.mxu1 %vm204_vm1, %v1094_v1 }
 0xc01   :  { %1296 = vrot.lane.b32.xlu1 %v1094_v1, %s2514_s25 }
 0xc05   :  { %1298 = vrot.lane.b32.xlu1 %v1095_v2, %s2514_s25 }
 0xc6f   :  { %v2415_v3 = vpop.permute.xlu1 %2414  ;;  %v2410_v4 = vpop.permute.xlu0 %2409 }
 0xc70   :  { %v2417_v5 = vunpack.i.h.bf16 %v2415_v3  ;;  %v2416_v6 = vunpack.i.l.bf16 %v2415_v3  ;;  %v2412_v7 = vunpack.i.h.bf16 %v2410_v4  ;;  %v2411_v8 = vunpack.i.l.bf16 %v2410_v4  ;;  %v1977_v3 = vld [vmem:[%s2958_s6 + $0x20] sm:$0xff]  ;;  %v1978_v4 = vld [vmem:[%s2958_s6 + $0x28] sm:$0xff] }
 0xc72   :  { %v2329_v9 = vpack.c.bf16 %v2412_v7, %v2411_v8  ;;  %v2339_v10 = vpack.c.bf16 %v2417_v5, %v2416_v6  ;;  %v2349_v5 = vpack.c.bf16 %v1978_v4, %v1977_v3  ;;  %v1979_v6 = vld [vmem:[%s2958_s6 + $0x30] sm:$0xff]  ;;  %v1980_v7 = vld [vmem:[%s2958_s6 + $0x38] sm:$0xff] }
 0xc73   :  { %v1297_v11 = vpop.permute.xlu1 %1296  ;;  %v2353_v8 = vpack.c.bf16 %v1980_v7, %v1979_v6  ;;  %v2003_v3 = vld [vmem:[%s2964_s12 + $0x70] sm:$0xff]  ;;  %v2004_v4 = vld [vmem:[%s2964_s12 + $0x78] sm:$0xff]  ;;  %v1994_v6 = vld [vmem:[%s2963_s11 + $0x1] ss:$0 sm:$0xff] }
 0xc74   :  { %2331 = vmatprep.subr.msk.bf16.mxu1 %vm2654_vm2, %v2329_v9 }
 0xc75   :  { %2334 = vmatpush3.bf16.xpose.msk.msra.mxu1 %vm2654_vm2, %v2329_v9 }
 0xc76   :  { %2341 = vmatprep.subr.msk.bf16.mxu1 %vm2654_vm2, %v2339_v10 }
 0xc77   :  { %v1299_v12 = vpop.permute.xlu1 %1298 }
 0xc7c   :  { %2197 = vmatmul.mubr.msk.f32.vlgmr.msra.gmra.mrb[10].mxu1 %vm204_vm1, %v1095_v2 }
 0xc7d   :  { %2344 = vmatpush3.bf16.xpose.msk.msra.mxu1 %vm2654_vm2, %v2339_v10  ;;  %2210 = vmatprep.mubr.msk.f32.mxu1 %vm204_vm1, %v1297_v11 }
 0xc84   :  { %2211 = vmatmul.mubr.msk.f32.vlgmr.msra.gmra.mrb[12].mxu1 %vm204_vm1, %v1299_v12 }
 0xd4f   :  { %v2198_v13 = vpop.f32.mrb[10].mxu1 }
 0xd50   :  { %v1184_v14 = vadd.f32 %v2198_v13, %v2672_v55  ;;  %v1178_v15 = vpop.f32.mrb[11].mxu1 }
 0xd51   :  { %v1179_v16 = vadd.f32 %v1178_v15, %v2677_v56 }
 0xd52   :  { %v1190_v17 = vsel %vm204_vm1, %v1184_v14, -inf }
 0xd53   :  { %1191 = vmax.xlane.f32.xlu1 %v1190_v17  ;;  %v1187_v35 = vsel %vm204_vm1, %v1179_v16, -inf  ;;  %v1982_v17 = vld [vmem:[%s2959_s7 + $0x1] ss:$0 sm:$0xff] }
 0xd54   :  { %1188 = vmax.xlane.f32.xlu0 %v1187_v35 }
 0xd57   :  { %v2212_v33 = vpop.f32.mrb[12].mxu1 }
 0xd58   :  { %v1378_v50 = vpop.f32.mrb[13].mxu1  ;;  %v1384_v19 = vadd.f32 %v2212_v33, %v2672_v55 }
 0xd59   :  { %v1379_v18 = vadd.f32 %v1378_v50, %v2677_v56 }
 0xd5a   :  { %v1390_v21 = vsel %vm204_vm1, %v1384_v19, -inf }
 0xd5b   :  { %v1387_v20 = vsel %vm204_vm1, %v1379_v18, -inf }
 0xd5c   :  { %1388 = vmax.xlane.f32.xlu0 %v1387_v20 }
 0xd60   :  { %1391 = vmax.xlane.f32.xlu0 %v1390_v21 }
 0xde0   :  { %v1192_v22 = vpop.xlane.xlu1 %1191 }
 0xde1   :  { %v1194_v23 = vsub.f32 %v1184_v14, %v1192_v22  ;;  %v1189_v24 = vpop.xlane.xlu0 %1188 }
 0xde2   :  { %v1193_v25 = vsub.f32 %v1179_v16, %v1189_v24 }
 0xde3   :  { %v1197_v26 = vmul.f32 1.442695, %v1194_v23 }
 0xde4   :  { %v1195_v27 = vmul.f32 1.442695, %v1193_v25 }
 0xde5   :  { %2460 = vpow2.f32 %v1197_v26 }
 0xde6   :  { %2462 = vpow2.f32 %v1195_v27 }
 0xde9   :  { %v1389_v28 = vpop.xlane.xlu0 %1388 }
 0xdea   :  { %v1393_v29 = vsub.f32 %v1379_v18, %v1389_v28 }
 0xdec   :  { %v1395_v30 = vmul.f32 1.442695, %v1393_v29 }
 0xded   :  { %v1392_v56 = vpop.xlane.xlu0 %1391 }
 0xdee   :  { %2464 = vpow2.f32 %v1395_v30  ;;  %v1394_v55 = vsub.f32 %v1384_v19, %v1392_v56 }
 0xdef   :  { %v2461_v31 = vpop.eup %2460 }
 0xdf0   :  { %v2463_v32 = vpop.eup %2462  ;;  %v1397_v34 = vmul.f32 1.442695, %v1394_v55  ;;  %v1202_v36 = vsel %vm204_vm1, %v2461_v31, 0.0  ;;  %v1990_v55 = vld [vmem:[%s2962_s10 + $0x28] sm:$0xff] }
 0xdf1   :  { %1203 = vadd.xlane.f32.xlu1 %v1202_v36  ;;  %v1199_v37 = vsel %vm204_vm1, %v2463_v32, 0.0 }
 0xdf2   :  { %2466 = vpow2.f32 %v1397_v34  ;;  %1200 = vadd.xlane.f32.xlu0 %v1199_v37  ;;  %v1992_v34 = vld [vmem:[%s2962_s10 + $0x38] sm:$0xff] }
 0xdf8   :  { %v2465_v38 = vpop.eup %2464 }
 0xdf9   :  { %v1399_v39 = vsel %vm204_vm1, %v2465_v38, 0.0 }
 0xdfa   :  { %1400 = vadd.xlane.f32.xlu0 %v1399_v39 }
 0xdfc   :  { %v2467_v40 = vpop.eup %2466 }
 0xdfd   :  { %v1402_v41 = vsel %vm204_vm1, %v2467_v40, 0.0 }
 0xdfe   :  { %1403 = vadd.xlane.f32.xlu1 %v1402_v41 }
 0xe0f   :  { %2424 = vrot.lane.b32.xlu1 %v2811_v0, %s2515_s1 }
 0xe10   :  { %2419 = vrot.lane.b32.xlu0 %v2811_v0, %s2516_s30 }
 0xe7e   :  { %v1204_v43 = vpop.xlane.xlu1 %1203 }
 0xe7f   :  { %v1201_v42 = vpop.xlane.xlu0 %1200 }
 0xe80   :  { %2468 = vrcp.f32 %v1201_v42 }
 0xe81   :  { %2470 = vrcp.f32 %v1204_v43 }
 0xe87   :  { %v1401_v44 = vpop.xlane.xlu0 %1400 }
 0xe88   :  { %2472 = vrcp.f32 %v1401_v44  ;;  %v1987_v44 = vld [vmem:[%s2960_s8 + $0x1] ss:$0 sm:$0xff] }
 0xe8a   :  { %v2469_v45 = vpop.eup %2468 }
 0xe8b   :  { %v1404_v46 = vpop.xlane.xlu1 %1403  ;;  %v2420_v47 = vpop.permute.xlu0 %2419  ;;  %v1207_v48 = vmul.f32 %v2469_v45, %v2463_v32  ;;  %v1991_v32 = vld [vmem:[%s2962_s10 + $0x30] sm:$0xff] }
 0xe8c   :  { %2474 = vrcp.f32 %v1404_v46  ;;  %v2422_v49 = vunpack.i.h.bf16 %v2420_v47  ;;  %v2421_v51 = vunpack.i.l.bf16 %v2420_v47  ;;  %v2471_v53 = vpop.eup %2470  ;;  %v2361_v36 = vpack.c.bf16 %v1992_v34, %v1991_v32  ;;  %v1988_v46 = vld [vmem:[%s2961_s9 + $0x1] ss:$0 sm:$0xff] }
 0xe8d   :  { %2203 = vmatprep.mubr.msk.f32.mxu0 %vm204_vm1, %v1207_v48  ;;  %v1208_v62 = vmul.f32 %v2471_v53, %v2461_v31 }
 0xe8e   :  { %v2335_v52 = vpack.c.bf16 %v2422_v49, %v2421_v51 }
 0xe8f   :  { %v2425_v54 = vpop.permute.xlu1 %2424 }
 0xe90   :  { %v2427_v59 = vunpack.i.h.bf16 %v2425_v54  ;;  %v2426_v60 = vunpack.i.l.bf16 %v2425_v54  ;;  %2336 = vmatprep.subr.bf16.mxu0 %v2335_v52  ;;  %v1997_v54 = vld [vmem:[%s2964_s12 + $0x40] sm:$0xff] }
 0xe91   :  { %2338 = vmatpush3.bf16.msra.mxu0 %v2335_v52 }
 0xe92   :  { %v2473_v61 = vpop.eup %2472  ;;  %v2345_v63 = vpack.c.bf16 %v2427_v59, %v2426_v60  ;;  %v1998_v59 = vld [vmem:[%s2964_s12 + $0x48] sm:$0xff] }
 0xe93   :  { %v1407_v0 = vmul.f32 %v2473_v61, %v2465_v38  ;;  %v2365_v60 = vpack.c.bf16 %v1998_v59, %v1997_v54  ;;  %v1999_v61 = vld [vmem:[%s2964_s12 + $0x50] sm:$0xff]  ;;  %v2012_v54 = vld [vmem:[%s2967_s15 + $0x1] ss:$0 sm:$0xff] }
 0xe94   :  { %2204 = vmatmul.mubr.msk.f32.vlgmr.msra.gmra.mrb[8].mxu0 %vm204_vm1, %v1208_v62  ;;  %2346 = vmatprep.subr.bf16.mxu0 %v2345_v63  ;;  %v2000_v62 = vld [vmem:[%s2964_s12 + $0x58] sm:$0xff] }
 0xe95   :  { %2348 = vmatpush3.bf16.msra.mxu0 %v2345_v63  ;;  %2217 = vmatprep.mubr.msk.f32.mxu0 %vm204_vm1, %v1407_v0  ;;  %v2369_v63 = vpack.c.bf16 %v2000_v62, %v1999_v61  ;;  %v2001_v0 = vld [vmem:[%s2964_s12 + $0x60] sm:$0xff] }
 0xe96   :  { %v2475_v1 = vpop.eup %2474  ;;  %2350 = vmatprep.subr.bf16.mxu0 %v2349_v5 }
 0xe97   :  { %v1408_v2 = vmul.f32 %v2475_v1, %v2467_v40  ;;  %v2002_v1 = vld [vmem:[%s2964_s12 + $0x68] sm:$0xff] }
 0xe99   :  { %2218 = vmatmul.mubr.msk.f32.vlgmr.msra.gmra.mrb[10].mxu0 %vm204_vm1, %v1408_v2  ;;  %v2373_v2 = vpack.c.bf16 %v2002_v1, %v2001_v0 }
 0xe9a   :  { %2352 = vmatpush3.bf16.msra.mxu0 %v2349_v5  ;;  %v2377_v5 = vpack.c.bf16 %v2004_v4, %v2003_v3 }
 0xe9b   :  { %2354 = vmatprep.subr.bf16.mxu0 %v2353_v8 }
 0xe9e   :  { %2356 = vmatpush3.bf16.msra.mxu0 %v2353_v8 }
 0xe9f   :  { %2366 = vmatprep.subr.bf16.mxu0 %v2365_v60 }
 0xf67   :  { %v2205_v9 = vpop.f32.mrb[8].mxu0 }
 0xf68   :  { %v1287_v10 = vpop.f32.mrb[9].mxu0 }
 0xf6c   :  { %v2219_v11 = vpop.f32.mrb[10].mxu0 }
 0xf6d   :  { %v1487_v12 = vpop.f32.mrb[11].mxu0 }
 0xf6e   :  { %1498 = vrot.lane.b32.xlu1 %v1487_v12, %s2517_s23 }
 0xf72   :  { %1500 = vrot.lane.b32.xlu1 %v2219_v11, %s2517_s23 }
 0xfe0   :  { %v1499_v13 = vpop.permute.xlu1 %1498 }
 0xfe1   :  { %v1504_v14 = vsel %vm204_vm1, %v1287_v10, %v1499_v13 }
 0xfe2   :  { %2228 = vmatprep.mubr.msk.f32.mxu0 %vm60_vm0, %v1504_v14 }
 0xfe4   :  { %v1501_v15 = vpop.permute.xlu1 %1500 }
 0xfe5   :  { %v1505_v16 = vsel %vm204_vm1, %v2205_v9, %v1501_v15 }
 0xfe6   :  { %2229 = vmatmul.mubr.msk.f32.vlgmr.msra.gmra.mrb[12].mxu0 %vm60_vm0, %v1505_v16 }
 0xfe7   :  { %2368 = vmatpush3.bf16.msra.mxu0 %v2365_v60 }
 0xfe8   :  { %2370 = vmatprep.subr.bf16.mxu0 %v2369_v63 }
 0xfeb   :  { %2372 = vmatpush3.bf16.msra.mxu0 %v2369_v63 }
 0xfec   :  { %2374 = vmatprep.subr.bf16.mxu0 %v2373_v2 }
 0xfef   :  { %2376 = vmatpush3.bf16.msra.mxu0 %v2373_v2 }
 0xff0   :  { %2378 = vmatprep.subr.bf16.mxu0 %v2377_v5 }
 0xff3   :  { %2380 = vmatpush3.bf16.msra.mxu0 %v2377_v5 }
0x10b9   :  { %v2230_v35 = vpop.f32.mrb[12].mxu0 }
0x10ba   :  { %v1597_v33 = vadd.f32 %v2230_v35, %v1982_v17  ;;  %v1591_v50 = vpop.f32.mrb[13].mxu0 }
0x10bb   :  { %v1592_v18 = vadd.f32 %v1982_v17, %v1591_v50 }
0x10bc   :  { %v1601_v19 = vadd.f32 %v1597_v33, %v2802_v58 }
0x10bd   :  { %v1600_v20 = vadd.f32 %v1592_v18, %v2800_v57  ;;  %v1989_v57 = vld [vmem:[%s2962_s10 + $0x20] sm:$0xff] }
0x10be   :  { %v1609_v21 = vsel %vm60_vm0, %v1601_v19, 0.0  ;;  %v2357_v31 = vpack.c.bf16 %v1990_v55, %v1989_v57 }
0x10bf   :  { %1610 = vadd.xlane.f32.xlu1 %v1609_v21  ;;  %v1606_v22 = vsel %vm60_vm0, %v1600_v20, 0.0 }
0x10c0   :  { %1607 = vadd.xlane.f32.xlu0 %v1606_v22  ;;  %2358 = vmatprep.subr.bf16.mxu1 %v2357_v31 }
0x10c1   :  { %2360 = vmatpush3.bf16.msra.mxu1 %v2357_v31 }
0x10c2   :  { %2362 = vmatprep.subr.bf16.mxu1 %v2361_v36 }
0x10c5   :  { %2364 = vmatpush3.bf16.msra.mxu1 %v2361_v36 }
0x114c   :  { %v1611_v23 = vpop.xlane.xlu1 %1610 }
0x114d   :  { %v1613_v24 = vmul.f32 0.03125, %v1611_v23  ;;  %v1608_v25 = vpop.xlane.xlu0 %1607 }
0x114e   :  { %v1612_v26 = vmul.f32 0.03125, %v1608_v25 }
0x114f   :  { %v1615_v27 = vsub.f32 %v1601_v19, %v1613_v24 }
0x1150   :  { %v1614_v28 = vsub.f32 %v1600_v20, %v1612_v26  ;;  %v2006_v26 = vld [vmem:[%s2965_s13 + $0x1] ss:$0 sm:$0xff] }
0x1151   :  { %v1617_v56 = vmul.f32 %v1615_v27, %v1615_v27 }
0x1152   :  { %v1616_v29 = vmul.f32 %v1614_v28, %v1614_v28 }
0x1153   :  { %v1621_v58 = vsel %vm60_vm0, %v1617_v56, 0.0 }
0x1154   :  { %v1618_v30 = vsel %vm60_vm0, %v1616_v29, 0.0 }
0x1155   :  { %1619 = vadd.xlane.f32.xlu0 %v1618_v30 }
0x1159   :  { %1622 = vadd.xlane.f32.xlu0 %v1621_v58 }
0x11e2   :  { %v1620_v37 = vpop.xlane.xlu0 %1619 }
0x11e3   :  { %v1624_v38 = vmul.f32 0.03125, %v1620_v37 }
0x11e5   :  { %v1626_v39 = vadd.f32 1e-12, %v1624_v38 }
0x11e6   :  { %v1623_v40 = vpop.xlane.xlu0 %1622 }
0x11e7   :  { %2476 = vrsqrt.f32 %v1626_v39  ;;  %v1625_v41 = vmul.f32 0.03125, %v1623_v40 }
0x11e9   :  { %v1627_v42 = vadd.f32 1e-12, %v1625_v41 }
0x11eb   :  { %2478 = vrsqrt.f32 %v1627_v42 }
0x11f1   :  { %v2477_v43 = vpop.eup %2476 }
0x11f2   :  { %v1630_v45 = vmul.f32 %v2477_v43, %v1614_v28 }
0x11f4   :  { %v1638_v47 = vmul.f32 %v1987_v44, %v1630_v45 }
0x11f5   :  { %v2479_v48 = vpop.eup %2478 }
0x11f6   :  { %v1631_v49 = vmul.f32 %v2479_v48, %v1615_v27  ;;  %v1646_v51 = vadd.f32 %v1988_v46, %v1638_v47 }
0x11f8   :  { %v1639_v52 = vmul.f32 %v1987_v44, %v1631_v49  ;;  %2239 = vmatprep.mubr.msk.f32.mxu1 %vm60_vm0, %v1646_v51 }
0x11fa   :  { %v1647_v53 = vadd.f32 %v1988_v46, %v1639_v52 }
0x11fc   :  { %2240 = vmatmul.mubr.msk.f32.vlgmr.msra.gmra.mrb[14].mxu1 %vm60_vm0, %v1647_v53 }
0x12cf   :  { %v2241_v7 = vpop.f32.mrb[14].mxu1 }
0x12d0   :  { %v1739_v8 = vadd.f32 %v2241_v7, %v1994_v6  ;;  %v1733_v9 = vpop.f32.mrb[15].mxu1 }
0x12d1   :  { %v1734_v10 = vadd.f32 %v1994_v6, %v1733_v9 }
0x12d2   :  { %v1743_v11 = vmul.f32 %v1739_v8, %v1739_v8 }
0x12d3   :  { %v1742_v12 = vmul.f32 %v1734_v10, %v1734_v10 }
0x12d4   :  { %v1745_v13 = vmul.f32 %v1743_v11, %v1739_v8 }
0x12d5   :  { %v1744_v14 = vmul.f32 %v1742_v12, %v1734_v10 }
0x12d6   :  { %v1747_v15 = vmul.f32 0.044715, %v1745_v13 }
0x12d7   :  { %v1746_v16 = vmul.f32 0.044715, %v1744_v14 }
0x12d8   :  { %v1749_v17 = vadd.f32 %v1747_v15, %v1739_v8 }
0x12d9   :  { %v1748_v35 = vadd.f32 %v1746_v16, %v1734_v10 }
0x12da   :  { %v1751_v33 = vmul.f32 0.7978846, %v1749_v17 }
0x12db   :  { %v1750_v50 = vmul.f32 0.7978846, %v1748_v35 }
0x12dc   :  { %2480 = vtanh.f32 %v1751_v33 }
0x12dd   :  { %2482 = vtanh.f32 %v1750_v50 }
0x12e6   :  { %v2481_v18 = vpop.eup %2480 }
0x12e7   :  { %v2483_v19 = vpop.eup %2482  ;;  %v1755_v20 = vadd.f32 1.0, %v2481_v18 }
0x12e8   :  { %v1754_v21 = vadd.f32 1.0, %v2483_v19 }
0x12e9   :  { %v1757_v22 = vmul.f32 0.5, %v1755_v20 }
0x12ea   :  { %v1756_v23 = vmul.f32 0.5, %v1754_v21 }
0x12eb   :  { %v1759_v25 = vmul.f32 %v1757_v22, %v1739_v8 }
0x12ec   :  { %v1758_v24 = vmul.f32 %v1756_v23, %v1734_v10 }
0x12ee   :  { %2258 = vmatprep.mubr.msk.f32.mxu0 %vm872_vm3, %v1758_v24 }
0x12ef   :  { %2259 = vmatmul.mubr.msk.f32.vlgmr.msra.gmra.mrb[14].mxu0 %vm872_vm3, %v1759_v25 }
0x13c2   :  { %v2260_v27 = vpop.f32.mrb[14].mxu0 }
0x13c3   :  { %v1855_v28 = vadd.f32 %v2260_v27, %v2006_v26  ;;  %v1849_v29 = vpop.f32.mrb[15].mxu0 }
0x13c4   :  { %v1850_v30 = vadd.f32 %v2006_v26, %v1849_v29 }
0x13c5   :  { %v1859_v56 = vadd.f32 %v1855_v28, %v1647_v53 }
0x13c6   :  { %v1858_v58 = vadd.f32 %v1850_v30, %v1646_v51  ;;  %v2011_v51 = vld [vmem:[%s2966_s14 + $0x1] ss:$0 sm:$0xff]  ;;  %s2488_s14 = scalar_lea.vmem %s1920_s20, 32 }
0x13c7   :  { %v1867_v57 = vsel %vm60_vm0, %v1859_v56, 0.0  ;;  %p2489_p0 = scmp.ne.s32.totalorder %s1920_s20, %s2488_s14  ;;  %p2494_p2 = scmp.lt.s32.totalorder %s2488_s14, %s2488_s14 }
0x13c8   :  { %1868 = vadd.xlane.f32.xlu0 %v1867_v57  ;;  %v1864_v55 = vsel %vm60_vm0, %v1858_v58, 0.0 }
0x13c9   :  { %1865 = vadd.xlane.f32.xlu1 %v1864_v55  ;;  %p2495_p3 = por %p2494_p2, %p2493_p1 }
0x13cb   :  { %p2496_p4 = pnand %p2495_p3, %p2489_p0 }
0x1455   :  { %v1869_v31 = vpop.xlane.xlu0 %1868 }
0x1456   :  { %v1871_v32 = vmul.f32 0.03125, %v1869_v31  ;;  %v1866_v34 = vpop.xlane.xlu1 %1865 }
0x1457   :  { %v1870_v36 = vmul.f32 0.03125, %v1866_v34 }
0x1458   :  { %v1873_v37 = vsub.f32 %v1859_v56, %v1871_v32 }
0x1459   :  { %v1872_v38 = vsub.f32 %v1858_v58, %v1870_v36 }
0x145a   :  { %v1875_v39 = vmul.f32 %v1873_v37, %v1873_v37 }
0x145b   :  { %v1874_v40 = vmul.f32 %v1872_v38, %v1872_v38 }
0x145c   :  { %v1879_v41 = vsel %vm60_vm0, %v1875_v39, 0.0 }
0x145d   :  { %1880 = vadd.xlane.f32.xlu0 %v1879_v41  ;;  %v1876_v42 = vsel %vm60_vm0, %v1874_v40, 0.0 }
0x145e   :  { %1877 = vadd.xlane.f32.xlu1 %v1876_v42 }
0x14ea   :  { %v1881_v43 = vpop.xlane.xlu0 %1880 }
0x14eb   :  { %v1883_v44 = vmul.f32 0.03125, %v1881_v43  ;;  %v1878_v45 = vpop.xlane.xlu1 %1877 }
0x14ec   :  { %v1882_v46 = vmul.f32 0.03125, %v1878_v45 }
0x14ed   :  { %v1885_v47 = vadd.f32 1e-12, %v1883_v44 }
0x14ee   :  { %v1884_v48 = vadd.f32 1e-12, %v1882_v46 }
0x14ef   :  { %2484 = vrsqrt.f32 %v1885_v47 }
0x14f0   :  { %2486 = vrsqrt.f32 %v1884_v48 }
0x14f9   :  { %v2485_v49 = vpop.eup %2484 }
0x14fa   :  { %v2487_v52 = vpop.eup %2486  ;;  %v1889_v53 = vmul.f32 %v2485_v49, %v1873_v37 }
0x14fb   :  { %v1888_v59 = vmul.f32 %v2487_v52, %v1872_v38 }
0x14fc   :  { %v1897_v60 = vmul.f32 %v2011_v51, %v1889_v53 }
0x14fd   :  { %v1896_v61 = vmul.f32 %v2011_v51, %v1888_v59 }
0x14fe   :  { %v1905_v62 = vadd.f32 %v2012_v54, %v1897_v60 }
0x14ff   :  { %v1904_v63 = vadd.f32 %v2012_v54, %v1896_v61 }
0x1500   :  { %v1907_v0 = vrot.slane %v1905_v62, 7 }
0x1502   :  { %v1910_v1 = vsel %vm1909_vm4, %v1904_v63, %v1907_v0 }
0x1503   :  { %1912 = vst.msk [vmem:[#allocation2] sm:$0x3] %vm1911_vm5, %v1910_v1 }
0x1504   :  { %2499 = shalt.err (!%p2496_p4)
}
0x1505   :  { %s2500_s22 = scalar_lea.hbm %s2968_s16, 32 }
0x1506   :  { %p2501_p5 = scmp.ne.s32.totalorder %s2968_s16, %s2500_s22  ;;  %p2504_p6 = scmp.lt.u32.totalorder %s2500_s22, %s2968_s16 }
0x1508   :  { %p2506_p7 = pnand %p2504_p6, %p2501_p5 }
0x150a   :  { %2509 = shalt.err (!%p2506_p7)
}
0x150b   :  { %1922 = dma.vmem_to_hbm [thread:$0]  %s1920_s20, 32, %s2968_s16, [#allocation3]  }
0x150c   :  { %2510 = dma.done.wait [#allocation3], 32  }
0x150d   :  { %2511 = vsyncadd [#allocation3], 4294967264 }
0x150e   :  { %1926 = vsyncpa [#allocation3], 1 }

</bundles_post_ra>
